<compile_context>
chip_gen: v5e
topology: v5e:2x2
jax: 0.10.0
libtpu: 0.0.40
codegen_flags: <defaults>
</compile_context>

<pallas_src>
import functools

import jax
import jax.numpy as jnp
from jax import lax
from jax.experimental import pallas as pl
from jax.experimental.pallas import tpu as pltpu


def _round_up(x, m):
    return ((x + m - 1) // m) * m


def _deeprnn_kernel(layer_size, t_block, b_pad, seq, h_pad,
                    x_ref,       # (t_block, B_pad, H_pad) bf16  (x @ W_xi, wrapper-gathered)
                    h0_ref,      # (L, B_pad, H_pad)       f32
                    whh0_ref,    # (H_pad, H_pad)          bf16
                    wcat_ref,    # (max(L-1,1), 2*H_pad, H_pad) bf16
                    bh_ref,      # (L, 1, H_pad)           f32
                    hid_ref,     # out: (t_block, B_pad, H_pad) bf16
                    hfin_ref,    # out: (L, B_pad, H_pad)  f32  (carried recurrent state)
                    lhs_ref):    # scratch: (B_pad, 2*H_pad) bf16
    tb = pl.program_id(0)

    # Initialize the resident carried state from h0 on the first grid step only.
    @pl.when(tb == 0)
    def _():
        hfin_ref[...] = h0_ref[...]

    # Only the tiny bias broadcasts are hoisted (one vreg each); the weight
    # matrices are read from their VMEM refs at the point of use to avoid
    # blowing the vreg file / spilling inside the unrolled time loop.
    b0 = jnp.broadcast_to(bh_ref[0], (b_pad, h_pad))
    bls = [jnp.broadcast_to(bh_ref[i], (b_pad, h_pad)) for i in range(1, layer_size)]

    need_tail_mask = (seq % t_block) != 0  # static Python bool

    def step(tt, carry):
        def body():
            # --- Layer 0: x contribution precomputed in the wrapper. ---
            h_prev = hfin_ref[0]
            pre = (x_ref[tt].astype(jnp.float32)
                   + jnp.dot(h_prev.astype(jnp.bfloat16), whh0_ref[...],
                             preferred_element_type=jnp.float32)
                   + b0)
            h_new = jnp.tanh(pre)
            hfin_ref[0] = h_new
            below = h_new

            # --- Layers 1..L-1: fused [below, h_prev] @ [[W_xh]; [W_hh]]. ---
            # Two lane-aligned full-tile stores into a persistent bf16 slab
            # replace the per-step lane-axis concatenate.
            for i in range(1, layer_size):
                lhs_ref[:, :h_pad] = below.astype(jnp.bfloat16)
                lhs_ref[:, h_pad:] = hfin_ref[i].astype(jnp.bfloat16)
                pre = jnp.dot(lhs_ref[...], wcat_ref[i - 1],
                              preferred_element_type=jnp.float32) + bls[i - 1]
                h_new = jnp.tanh(pre)
                hfin_ref[i] = h_new
                below = h_new

            # Emit last-layer hidden state; the output GEMM runs outside.
            hid_ref[tt] = below.astype(jnp.bfloat16)

        if need_tail_mask:
            gt = tb * t_block + tt
            pl.when(gt < seq)(body)
        else:
            body()
        return carry

    lax.fori_loop(0, t_block, step, 0, unroll=True)


def deeprnn_forward(x_ids, state0, params, *, t_block=16):
    """x_ids: (batch, seq) int32 token ids; state0: (L, B, H) f32.

    Returns (logits (seq*batch, vocab) f32, h_final (L, B, H) f32), matching
    the PyTorch module's forward (one-hot input, stacked tanh RNN layers,
    linear readout, outputs concatenated along time-major rows).
    """
    W_xi, W_xh, W_hh, b_h, W_ho, b_o = params
    vocab, hidden = W_xi.shape
    layer_size = W_hh.shape[0]
    batch, seq = x_ids.shape

    f32, bf16 = jnp.float32, jnp.bfloat16

    b_pad = _round_up(batch, 8)
    h_pad = _round_up(hidden, 128)

    t_block = max(1, min(t_block, seq))
    seq_pad = _round_up(seq, t_block)

    # ---- Wrapper-side embedding gather (replaces in-kernel one-hot/gather). ----
    # x_emb[t, b] = W_xi[x_ids[b, t]]  ==  one_hot(x.T) @ W_xi
    x_emb = jnp.take(W_xi.astype(f32), x_ids.T.astype(jnp.int32), axis=0)  # (seq, B, H)
    x_emb_p = jnp.zeros((seq_pad, b_pad, h_pad), bf16)
    x_emb_p = x_emb_p.at[:seq, :batch, :hidden].set(x_emb.astype(bf16))

    def pad2(a, r, c):
        return jnp.zeros((r, c), a.dtype).at[:a.shape[0], :a.shape[1]].set(a)

    # ---- Padded / fused parameters (done once in the wrapper). ----
    W_hh0_p = pad2(W_hh[0].astype(f32), h_pad, h_pad).astype(bf16)

    n_cat = max(layer_size - 1, 1)
    W_cat_p = jnp.zeros((n_cat, 2 * h_pad, h_pad), bf16)
    for i in range(1, layer_size):
        blk = jnp.concatenate(
            [pad2(W_xh[i - 1].astype(f32), h_pad, h_pad),
             pad2(W_hh[i].astype(f32), h_pad, h_pad)], axis=0).astype(bf16)
        W_cat_p = W_cat_p.at[i - 1].set(blk)

    b_h_p = jnp.zeros((layer_size, 1, h_pad), f32).at[:, 0, :hidden].set(b_h.astype(f32))
    state0_p = jnp.zeros((layer_size, b_pad, h_pad), f32).at[:, :batch, :hidden].set(
        state0.astype(f32))

    kernel = functools.partial(_deeprnn_kernel, layer_size, t_block, b_pad, seq, h_pad)

    def const(shape):
        return pl.BlockSpec(shape, lambda t: (0,) * len(shape))

    hid_out, h_final = pl.pallas_call(
        kernel,
        out_shape=(
            jax.ShapeDtypeStruct((seq_pad, b_pad, h_pad), bf16),
            jax.ShapeDtypeStruct((layer_size, b_pad, h_pad), f32),
        ),
        grid_spec=pltpu.PrefetchScalarGridSpec(
            num_scalar_prefetch=0,
            grid=(seq_pad // t_block,),
            in_specs=[
                pl.BlockSpec((t_block, b_pad, h_pad), lambda t: (t, 0, 0)),  # x_emb
                const((layer_size, b_pad, h_pad)),                           # state0
                const((h_pad, h_pad)),                                       # W_hh[0]
                const((n_cat, 2 * h_pad, h_pad)),                            # [W_xh; W_hh]
                const((layer_size, 1, h_pad)),                               # b_h
            ],
            out_specs=[
                pl.BlockSpec((t_block, b_pad, h_pad), lambda t: (t, 0, 0)),  # hidden states
                const((layer_size, b_pad, h_pad)),                           # carried state
            ],
            scratch_shapes=[pltpu.VMEM((b_pad, 2 * h_pad), bf16)],           # fused-LHS slab
        ),
        compiler_params=pltpu.CompilerParams(
            dimension_semantics=("arbitrary",),            # serial recurrence
            vmem_limit_bytes=32 * 1024 * 1024,             # fits the v7x 64 MiB budget
        ),
    )(x_emb_p, state0_p, W_hh0_p, W_cat_p, b_h_p)

    # ---- Externalized output projection: one large GEMM in plain XLA. ----
    h_seq = hid_out[:seq, :batch, :hidden].astype(f32)          # (seq, batch, hidden)
    logits = h_seq.reshape(seq * batch, hidden) @ W_ho.astype(f32) + b_o.astype(f32)
    h_final = h_final[:, :batch, :hidden]
    return logits, h_final


def deeprnn_reference(x_ids, state0, params):
    """Pure-JAX f32 mirror of the PyTorch forward, for verification."""
    W_xi, W_xh, W_hh, b_h, W_ho, b_o = params
    vocab = W_xi.shape[0]
    L = W_hh.shape[0]
    x_oh = jax.nn.one_hot(x_ids.T, vocab, dtype=jnp.float32)
    state = [state0[i] for i in range(L)]
    outs = []
    for t in range(x_oh.shape[0]):
        xt = x_oh[t]
        state[0] = jnp.tanh(xt @ W_xi + state[0] @ W_hh[0] + b_h[0])
        for i in range(1, L):
            state[i] = jnp.tanh(state[i - 1] @ W_xh[i - 1]
                                + state[i] @ W_hh[i] + b_h[i])
        outs.append(state[L - 1] @ W_ho + b_o)
    return jnp.concatenate(outs, axis=0), jnp.stack(state)


if __name__ == "__main__":
    vocab_size, hidden_size, layer_size = 16, 32, 3
    batch, seq = 2, 8

    key = jax.random.PRNGKey(0)
    k1, k2, k3, k4, k5 = jax.random.split(key, 5)

    # Deterministic parameter init mirroring the module's __init__.
    W_xi = 0.01 * jax.random.normal(k1, (vocab_size, hidden_size), jnp.float32)
    W_xh = 0.01 * jax.random.normal(k2, (layer_size - 1, hidden_size, hidden_size), jnp.float32)
    W_hh = 0.01 * jax.random.normal(k3, (layer_size, hidden_size, hidden_size), jnp.float32)
    b_h = jnp.zeros((layer_size, hidden_size), jnp.float32)
    W_ho = 0.01 * jax.random.normal(k4, (hidden_size, vocab_size), jnp.float32)
    b_o = jnp.zeros((vocab_size,), jnp.float32)
    params = (W_xi, W_xh, W_hh, b_h, W_ho, b_o)

    x_ids = jax.random.randint(k5, (batch, seq), 0, vocab_size, dtype=jnp.int32)
    state0 = jnp.zeros((layer_size, batch, hidden_size), jnp.float32)  # init_state

    ref_logits, ref_h = deeprnn_reference(x_ids, state0, params)

    # Case 1: t_block=3 -> seq padded 8->9, 3 grid steps: exercises the state
    # carry across grid steps AND the pl.when tail mask.
    logits, h_final = deeprnn_forward(x_ids, state0, params, t_block=3)
    jax.block_until_ready((logits, h_final))
    assert logits.shape == (seq * batch, vocab_size)
    assert h_final.shape == (layer_size, batch, hidden_size)
    assert jnp.allclose(logits, ref_logits, atol=1e-3, rtol=1e-2), \
        float(jnp.max(jnp.abs(logits - ref_logits)))
    assert jnp.allclose(h_final, ref_h, atol=1e-3, rtol=1e-2), \
        float(jnp.max(jnp.abs(h_final - ref_h)))

    # Case 2: t_block=8 -> single grid block, no tail mask (unmasked fast path).
    logits2, h_final2 = deeprnn_forward(x_ids, state0, params, t_block=8)
    jax.block_until_ready((logits2, h_final2))
    assert jnp.allclose(logits2, ref_logits, atol=1e-3, rtol=1e-2), \
        float(jnp.max(jnp.abs(logits2 - ref_logits)))
    assert jnp.allclose(h_final2, ref_h, atol=1e-3, rtol=1e-2), \
        float(jnp.max(jnp.abs(h_final2 - ref_h)))

    print("KERNEL_OK")
</pallas_src>

<mosaic_0001>
module attributes {stable_mosaic.version = 11 : i64} {
  func.func @_deeprnn_kernel(%arg0: i32, %arg1: memref<3x8x128xbf16, #tpu.memory_space<vmem>>, %arg2: memref<3x8x128xf32, #tpu.memory_space<vmem>>, %arg3: memref<128x128xbf16, #tpu.memory_space<vmem>>, %arg4: memref<2x256x128xbf16, #tpu.memory_space<vmem>>, %arg5: memref<3x1x128xf32, #tpu.memory_space<vmem>>, %arg6: memref<3x8x128xbf16, #tpu.memory_space<vmem>>, %arg7: memref<3x8x128xf32, #tpu.memory_space<vmem>>, %arg8: memref<8x256xbf16, #tpu.memory_space<vmem>>) attributes {dimension_semantics = [#tpu.dimension_semantics<arbitrary>], iteration_bounds = array<i64: 3>, scalar_prefetch = 0 : i64, scratch_operands = 1 : i64, tpu.core_type = #tpu.core_type<tc>, window_params = [{transform_indices = @transform_0, window_bounds = array<i64: 3, 8, 128>}, {pipeline_mode = #tpu.pipeline_mode<synchronous>, transform_indices = @transform_1, window_bounds = array<i64: 3, 8, 128>}, {pipeline_mode = #tpu.pipeline_mode<synchronous>, transform_indices = @transform_2, window_bounds = array<i64: 128, 128>}, {pipeline_mode = #tpu.pipeline_mode<synchronous>, transform_indices = @transform_3, window_bounds = array<i64: 2, 256, 128>}, {pipeline_mode = #tpu.pipeline_mode<synchronous>, transform_indices = @transform_4, window_bounds = array<i64: 3, 1, 128>}, {transform_indices = @transform_5, window_bounds = array<i64: 3, 8, 128>}, {pipeline_mode = #tpu.pipeline_mode<synchronous>, transform_indices = @transform_6, window_bounds = array<i64: 3, 8, 128>}]} {
    %c0_i32 = arith.constant 0 : i32
    %0 = arith.cmpi eq, %arg0, %c0_i32 : i32
    %1 = arith.extui %0 : i1 to i32
    %c0_i32_0 = arith.constant 0 : i32
    %2 = arith.cmpi ne, %1, %c0_i32_0 : i32
    scf.if %2 {
      %c0_16 = arith.constant 0 : index
      %c0_17 = arith.constant 0 : index
      %c0_18 = arith.constant 0 : index
      %30 = vector.load %arg2[%c0_16, %c0_17, %c0_18] : memref<3x8x128xf32, #tpu.memory_space<vmem>>, vector<3x8x128xf32>
      %c0_19 = arith.constant 0 : index
      %c0_20 = arith.constant 0 : index
      %c0_21 = arith.constant 0 : index
      %31 = vector.load %arg7[%c0_19, %c0_20, %c0_21] : memref<3x8x128xf32, #tpu.memory_space<vmem>>, vector<3x8x128xf32>
      tpu.vector_store %arg7[%c0_19, %c0_20, %c0_21], %30 {strides = array<i32>} : memref<3x8x128xf32, #tpu.memory_space<vmem>>, vector<3x8x128xf32>,
    } else {
    }
    %c0 = arith.constant 0 : index
    %c0_1 = arith.constant 0 : index
    %c0_2 = arith.constant 0 : index
    %3 = vector.load %arg5[%c0, %c0_1, %c0_2] : memref<3x1x128xf32, #tpu.memory_space<vmem>>, vector<1x1x128xf32>
    %4 = vector.shape_cast %3 : vector<1x1x128xf32> to vector<1x128xf32>
    %5 = vector.shape_cast %4 : vector<1x128xf32> to vector<1x128xf32>
    %6 = vector.broadcast %5 : vector<1x128xf32> to vector<8x128xf32>
    %c1 = arith.constant 1 : index
    %c0_3 = arith.constant 0 : index
    %c0_4 = arith.constant 0 : index
    %7 = vector.load %arg5[%c1, %c0_3, %c0_4] : memref<3x1x128xf32, #tpu.memory_space<vmem>>, vector<1x1x128xf32>
    %8 = vector.shape_cast %7 : vector<1x1x128xf32> to vector<1x128xf32>
    %9 = vector.shape_cast %8 : vector<1x128xf32> to vector<1x128xf32>
    %10 = vector.broadcast %9 : vector<1x128xf32> to vector<8x128xf32>
    %c2 = arith.constant 2 : index
    %c0_5 = arith.constant 0 : index
    %c0_6 = arith.constant 0 : index
    %11 = vector.load %arg5[%c2, %c0_5, %c0_6] : memref<3x1x128xf32, #tpu.memory_space<vmem>>, vector<1x1x128xf32>
    %12 = vector.shape_cast %11 : vector<1x1x128xf32> to vector<1x128xf32>
    %13 = vector.shape_cast %12 : vector<1x128xf32> to vector<1x128xf32>
    %14 = vector.broadcast %13 : vector<1x128xf32> to vector<8x128xf32>
    %c0_i32_7 = arith.constant 0 : i32
    %c3_i32 = arith.constant 3 : i32
    %15 = arith.muli %arg0, %c3_i32 : i32
    %16 = arith.addi %15, %c0_i32_7 : i32
    %c8_i32 = arith.constant 8 : i32
    %17 = arith.cmpi slt, %16, %c8_i32 : i32
    %18 = arith.extui %17 : i1 to i32
    %c0_i32_8 = arith.constant 0 : i32
    %19 = arith.cmpi ne, %18, %c0_i32_8 : i32
    scf.if %19 {
      %c0_16 = arith.constant 0 : index
      %c0_17 = arith.constant 0 : index
      %c0_18 = arith.constant 0 : index
      %30 = vector.load %arg7[%c0_16, %c0_17, %c0_18] : memref<3x8x128xf32, #tpu.memory_space<vmem>>, vector<1x8x128xf32>
      %31 = vector.shape_cast %30 : vector<1x8x128xf32> to vector<8x128xf32>
      %32 = arith.index_cast %c0_i32_7 : i32 to index
      %c0_19 = arith.constant 0 : index
      %c0_20 = arith.constant 0 : index
      %33 = vector.load %arg1[%32, %c0_19, %c0_20] : memref<3x8x128xbf16, #tpu.memory_space<vmem>>, vector<1x8x128xbf16>
      %34 = vector.shape_cast %33 : vector<1x8x128xbf16> to vector<8x128xbf16>
      %35 = arith.extf %34 : vector<8x128xbf16> to vector<8x128xf32>
      %36 = arith.truncf %31 : vector<8x128xf32> to vector<8x128xbf16>
      %c0_21 = arith.constant 0 : index
      %c0_22 = arith.constant 0 : index
      %37 = vector.load %arg3[%c0_21, %c0_22] : memref<128x128xbf16, #tpu.memory_space<vmem>>, vector<128x128xbf16>
      %cst = arith.constant dense<0.000000e+00> : vector<8x128xf32>
      %38 = tpu.matmul %36, %37, %cst {dimension_numbers = #tpu.dot_dimension_numbers<[1], [0], [0], [1], [0, 0, 1, 1], [], []>} : vector<8x128xbf16>, vector<128x128xbf16>, vector<8x128xf32> -> vector<8x128xf32>
      %39 = arith.addf %35, %38 : vector<8x128xf32>
      %40 = arith.addf %39, %6 : vector<8x128xf32>
      %41 = math.tanh %40 : vector<8x128xf32>
      %c0_23 = arith.constant 0 : index
      %c0_24 = arith.constant 0 : index
      %c0_25 = arith.constant 0 : index
      %42 = vector.load %arg7[%c0_23, %c0_24, %c0_25] : memref<3x8x128xf32, #tpu.memory_space<vmem>>, vector<1x8x128xf32>
      %43 = vector.shape_cast %42 : vector<1x8x128xf32> to vector<8x128xf32>
      %44 = vector.shape_cast %41 : vector<8x128xf32> to vector<1x8x128xf32>
      tpu.vector_store %arg7[%c0_23, %c0_24, %c0_25], %44 {strides = array<i32>} : memref<3x8x128xf32, #tpu.memory_space<vmem>>, vector<1x8x128xf32>,
      %45 = arith.truncf %41 : vector<8x128xf32> to vector<8x128xbf16>
      %c0_26 = arith.constant 0 : index
      %c0_27 = arith.constant 0 : index
      %46 = vector.load %arg8[%c0_26, %c0_27] : memref<8x256xbf16, #tpu.memory_space<vmem>>, vector<8x128xbf16>
      tpu.vector_store %arg8[%c0_26, %c0_27], %45 {strides = array<i32>} : memref<8x256xbf16, #tpu.memory_space<vmem>>, vector<8x128xbf16>,
      %c1_28 = arith.constant 1 : index
      %c0_29 = arith.constant 0 : index
      %c0_30 = arith.constant 0 : index
      %47 = vector.load %arg7[%c1_28, %c0_29, %c0_30] : memref<3x8x128xf32, #tpu.memory_space<vmem>>, vector<1x8x128xf32>
      %48 = vector.shape_cast %47 : vector<1x8x128xf32> to vector<8x128xf32>
      %49 = arith.truncf %48 : vector<8x128xf32> to vector<8x128xbf16>
      %c0_31 = arith.constant 0 : index
      %c128 = arith.constant 128 : index
      %50 = vector.load %arg8[%c0_31, %c128] : memref<8x256xbf16, #tpu.memory_space<vmem>>, vector<8x128xbf16>
      tpu.vector_store %arg8[%c0_31, %c128], %49 {strides = array<i32>} : memref<8x256xbf16, #tpu.memory_space<vmem>>, vector<8x128xbf16>,
      %c0_32 = arith.constant 0 : index
      %c0_33 = arith.constant 0 : index
      %51 = vector.load %arg8[%c0_32, %c0_33] : memref<8x256xbf16, #tpu.memory_space<vmem>>, vector<8x256xbf16>
      %c0_34 = arith.constant 0 : index
      %c0_35 = arith.constant 0 : index
      %c0_36 = arith.constant 0 : index
      %52 = vector.load %arg4[%c0_34, %c0_35, %c0_36] : memref<2x256x128xbf16, #tpu.memory_space<vmem>>, vector<1x256x128xbf16>
      %53 = vector.shape_cast %52 : vector<1x256x128xbf16> to vector<256x128xbf16>
      %cst_37 = arith.constant dense<0.000000e+00> : vector<8x128xf32>
      %54 = tpu.matmul %51, %53, %cst_37 {dimension_numbers = #tpu.dot_dimension_numbers<[1], [0], [0], [1], [0, 0, 1, 1], [], []>} : vector<8x256xbf16>, vector<256x128xbf16>, vector<8x128xf32> -> vector<8x128xf32>
      %55 = arith.addf %54, %10 : vector<8x128xf32>
      %56 = math.tanh %55 : vector<8x128xf32>
      %c1_38 = arith.constant 1 : index
      %c0_39 = arith.constant 0 : index
      %c0_40 = arith.constant 0 : index
      %57 = vector.load %arg7[%c1_38, %c0_39, %c0_40] : memref<3x8x128xf32, #tpu.memory_space<vmem>>, vector<1x8x128xf32>
      %58 = vector.shape_cast %57 : vector<1x8x128xf32> to vector<8x128xf32>
      %59 = vector.shape_cast %56 : vector<8x128xf32> to vector<1x8x128xf32>
      tpu.vector_store %arg7[%c1_38, %c0_39, %c0_40], %59 {strides = array<i32>} : memref<3x8x128xf32, #tpu.memory_space<vmem>>, vector<1x8x128xf32>,
      %60 = arith.truncf %56 : vector<8x128xf32> to vector<8x128xbf16>
      %c0_41 = arith.constant 0 : index
      %c0_42 = arith.constant 0 : index
      %61 = vector.load %arg8[%c0_41, %c0_42] : memref<8x256xbf16, #tpu.memory_space<vmem>>, vector<8x128xbf16>
      tpu.vector_store %arg8[%c0_41, %c0_42], %60 {strides = array<i32>} : memref<8x256xbf16, #tpu.memory_space<vmem>>, vector<8x128xbf16>,
      %c2_43 = arith.constant 2 : index
      %c0_44 = arith.constant 0 : index
      %c0_45 = arith.constant 0 : index
      %62 = vector.load %arg7[%c2_43, %c0_44, %c0_45] : memref<3x8x128xf32, #tpu.memory_space<vmem>>, vector<1x8x128xf32>
      %63 = vector.shape_cast %62 : vector<1x8x128xf32> to vector<8x128xf32>
      %64 = arith.truncf %63 : vector<8x128xf32> to vector<8x128xbf16>
      %c0_46 = arith.constant 0 : index
      %c128_47 = arith.constant 128 : index
      %65 = vector.load %arg8[%c0_46, %c128_47] : memref<8x256xbf16, #tpu.memory_space<vmem>>, vector<8x128xbf16>
      tpu.vector_store %arg8[%c0_46, %c128_47], %64 {strides = array<i32>} : memref<8x256xbf16, #tpu.memory_space<vmem>>, vector<8x128xbf16>,
      %c0_48 = arith.constant 0 : index
      %c0_49 = arith.constant 0 : index
      %66 = vector.load %arg8[%c0_48, %c0_49] : memref<8x256xbf16, #tpu.memory_space<vmem>>, vector<8x256xbf16>
      %c1_50 = arith.constant 1 : index
      %c0_51 = arith.constant 0 : index
      %c0_52 = arith.constant 0 : index
      %67 = vector.load %arg4[%c1_50, %c0_51, %c0_52] : memref<2x256x128xbf16, #tpu.memory_space<vmem>>, vector<1x256x128xbf16>
      %68 = vector.shape_cast %67 : vector<1x256x128xbf16> to vector<256x128xbf16>
      %cst_53 = arith.constant dense<0.000000e+00> : vector<8x128xf32>
      %69 = tpu.matmul %66, %68, %cst_53 {dimension_numbers = #tpu.dot_dimension_numbers<[1], [0], [0], [1], [0, 0, 1, 1], [], []>} : vector<8x256xbf16>, vector<256x128xbf16>, vector<8x128xf32> -> vector<8x128xf32>
      %70 = arith.addf %69, %14 : vector<8x128xf32>
      %71 = math.tanh %70 : vector<8x128xf32>
      %c2_54 = arith.constant 2 : index
      %c0_55 = arith.constant 0 : index
      %c0_56 = arith.constant 0 : index
      %72 = vector.load %arg7[%c2_54, %c0_55, %c0_56] : memref<3x8x128xf32, #tpu.memory_space<vmem>>, vector<1x8x128xf32>
      %73 = vector.shape_cast %72 : vector<1x8x128xf32> to vector<8x128xf32>
      %74 = vector.shape_cast %71 : vector<8x128xf32> to vector<1x8x128xf32>
      tpu.vector_store %arg7[%c2_54, %c0_55, %c0_56], %74 {strides = array<i32>} : memref<3x8x128xf32, #tpu.memory_space<vmem>>, vector<1x8x128xf32>,
      %75 = arith.truncf %71 : vector<8x128xf32> to vector<8x128xbf16>
      %76 = arith.index_cast %c0_i32_7 : i32 to index
      %c0_57 = arith.constant 0 : index
      %c0_58 = arith.constant 0 : index
      %77 = vector.load %arg6[%76, %c0_57, %c0_58] : memref<3x8x128xbf16, #tpu.memory_space<vmem>>, vector<1x8x128xbf16>
      %78 = vector.shape_cast %77 : vector<1x8x128xbf16> to vector<8x128xbf16>
      %79 = vector.shape_cast %75 : vector<8x128xbf16> to vector<1x8x128xbf16>
      tpu.vector_store %arg6[%76, %c0_57, %c0_58], %79 {strides = array<i32>} : memref<3x8x128xbf16, #tpu.memory_space<vmem>>, vector<1x8x128xbf16>,
    } else {
    }
    %c1_i32 = arith.constant 1 : i32
    %c3_i32_9 = arith.constant 3 : i32
    %20 = arith.muli %arg0, %c3_i32_9 : i32
    %21 = arith.addi %20, %c1_i32 : i32
    %c8_i32_10 = arith.constant 8 : i32
    %22 = arith.cmpi slt, %21, %c8_i32_10 : i32
    %23 = arith.extui %22 : i1 to i32
    %c0_i32_11 = arith.constant 0 : i32
    %24 = arith.cmpi ne, %23, %c0_i32_11 : i32
    scf.if %24 {
      %c0_16 = arith.constant 0 : index
      %c0_17 = arith.constant 0 : index
      %c0_18 = arith.constant 0 : index
      %30 = vector.load %arg7[%c0_16, %c0_17, %c0_18] : memref<3x8x128xf32, #tpu.memory_space<vmem>>, vector<1x8x128xf32>
      %31 = vector.shape_cast %30 : vector<1x8x128xf32> to vector<8x128xf32>
      %32 = arith.index_cast %c1_i32 : i32 to index
      %c0_19 = arith.constant 0 : index
      %c0_20 = arith.constant 0 : index
      %33 = vector.load %arg1[%32, %c0_19, %c0_20] : memref<3x8x128xbf16, #tpu.memory_space<vmem>>, vector<1x8x128xbf16>
      %34 = vector.shape_cast %33 : vector<1x8x128xbf16> to vector<8x128xbf16>
      %35 = arith.extf %34 : vector<8x128xbf16> to vector<8x128xf32>
      %36 = arith.truncf %31 : vector<8x128xf32> to vector<8x128xbf16>
      %c0_21 = arith.constant 0 : index
      %c0_22 = arith.constant 0 : index
      %37 = vector.load %arg3[%c0_21, %c0_22] : memref<128x128xbf16, #tpu.memory_space<vmem>>, vector<128x128xbf16>
      %cst = arith.constant dense<0.000000e+00> : vector<8x128xf32>
      %38 = tpu.matmul %36, %37, %cst {dimension_numbers = #tpu.dot_dimension_numbers<[1], [0], [0], [1], [0, 0, 1, 1], [], []>} : vector<8x128xbf16>, vector<128x128xbf16>, vector<8x128xf32> -> vector<8x128xf32>
      %39 = arith.addf %35, %38 : vector<8x128xf32>
      %40 = arith.addf %39, %6 : vector<8x128xf32>
      %41 = math.tanh %40 : vector<8x128xf32>
      %c0_23 = arith.constant 0 : index
      %c0_24 = arith.constant 0 : index
      %c0_25 = arith.constant 0 : index
      %42 = vector.load %arg7[%c0_23, %c0_24, %c0_25] : memref<3x8x128xf32, #tpu.memory_space<vmem>>, vector<1x8x128xf32>
      %43 = vector.shape_cast %42 : vector<1x8x128xf32> to vector<8x128xf32>
      %44 = vector.shape_cast %41 : vector<8x128xf32> to vector<1x8x128xf32>
      tpu.vector_store %arg7[%c0_23, %c0_24, %c0_25], %44 {strides = array<i32>} : memref<3x8x128xf32, #tpu.memory_space<vmem>>, vector<1x8x128xf32>,
      %45 = arith.truncf %41 : vector<8x128xf32> to vector<8x128xbf16>
      %c0_26 = arith.constant 0 : index
      %c0_27 = arith.constant 0 : index
      %46 = vector.load %arg8[%c0_26, %c0_27] : memref<8x256xbf16, #tpu.memory_space<vmem>>, vector<8x128xbf16>
      tpu.vector_store %arg8[%c0_26, %c0_27], %45 {strides = array<i32>} : memref<8x256xbf16, #tpu.memory_space<vmem>>, vector<8x128xbf16>,
      %c1_28 = arith.constant 1 : index
      %c0_29 = arith.constant 0 : index
      %c0_30 = arith.constant 0 : index
      %47 = vector.load %arg7[%c1_28, %c0_29, %c0_30] : memref<3x8x128xf32, #tpu.memory_space<vmem>>, vector<1x8x128xf32>
      %48 = vector.shape_cast %47 : vector<1x8x128xf32> to vector<8x128xf32>
      %49 = arith.truncf %48 : vector<8x128xf32> to vector<8x128xbf16>
      %c0_31 = arith.constant 0 : index
      %c128 = arith.constant 128 : index
      %50 = vector.load %arg8[%c0_31, %c128] : memref<8x256xbf16, #tpu.memory_space<vmem>>, vector<8x128xbf16>
      tpu.vector_store %arg8[%c0_31, %c128], %49 {strides = array<i32>} : memref<8x256xbf16, #tpu.memory_space<vmem>>, vector<8x128xbf16>,
      %c0_32 = arith.constant 0 : index
      %c0_33 = arith.constant 0 : index
      %51 = vector.load %arg8[%c0_32, %c0_33] : memref<8x256xbf16, #tpu.memory_space<vmem>>, vector<8x256xbf16>
      %c0_34 = arith.constant 0 : index
      %c0_35 = arith.constant 0 : index
      %c0_36 = arith.constant 0 : index
      %52 = vector.load %arg4[%c0_34, %c0_35, %c0_36] : memref<2x256x128xbf16, #tpu.memory_space<vmem>>, vector<1x256x128xbf16>
      %53 = vector.shape_cast %52 : vector<1x256x128xbf16> to vector<256x128xbf16>
      %cst_37 = arith.constant dense<0.000000e+00> : vector<8x128xf32>
      %54 = tpu.matmul %51, %53, %cst_37 {dimension_numbers = #tpu.dot_dimension_numbers<[1], [0], [0], [1], [0, 0, 1, 1], [], []>} : vector<8x256xbf16>, vector<256x128xbf16>, vector<8x128xf32> -> vector<8x128xf32>
      %55 = arith.addf %54, %10 : vector<8x128xf32>
      %56 = math.tanh %55 : vector<8x128xf32>
      %c1_38 = arith.constant 1 : index
      %c0_39 = arith.constant 0 : index
      %c0_40 = arith.constant 0 : index
      %57 = vector.load %arg7[%c1_38, %c0_39, %c0_40] : memref<3x8x128xf32, #tpu.memory_space<vmem>>, vector<1x8x128xf32>
      %58 = vector.shape_cast %57 : vector<1x8x128xf32> to vector<8x128xf32>
      %59 = vector.shape_cast %56 : vector<8x128xf32> to vector<1x8x128xf32>
      tpu.vector_store %arg7[%c1_38, %c0_39, %c0_40], %59 {strides = array<i32>} : memref<3x8x128xf32, #tpu.memory_space<vmem>>, vector<1x8x128xf32>,
      %60 = arith.truncf %56 : vector<8x128xf32> to vector<8x128xbf16>
      %c0_41 = arith.constant 0 : index
      %c0_42 = arith.constant 0 : index
      %61 = vector.load %arg8[%c0_41, %c0_42] : memref<8x256xbf16, #tpu.memory_space<vmem>>, vector<8x128xbf16>
      tpu.vector_store %arg8[%c0_41, %c0_42], %60 {strides = array<i32>} : memref<8x256xbf16, #tpu.memory_space<vmem>>, vector<8x128xbf16>,
      %c2_43 = arith.constant 2 : index
      %c0_44 = arith.constant 0 : index
      %c0_45 = arith.constant 0 : index
      %62 = vector.load %arg7[%c2_43, %c0_44, %c0_45] : memref<3x8x128xf32, #tpu.memory_space<vmem>>, vector<1x8x128xf32>
      %63 = vector.shape_cast %62 : vector<1x8x128xf32> to vector<8x128xf32>
      %64 = arith.truncf %63 : vector<8x128xf32> to vector<8x128xbf16>
      %c0_46 = arith.constant 0 : index
      %c128_47 = arith.constant 128 : index
      %65 = vector.load %arg8[%c0_46, %c128_47] : memref<8x256xbf16, #tpu.memory_space<vmem>>, vector<8x128xbf16>
      tpu.vector_store %arg8[%c0_46, %c128_47], %64 {strides = array<i32>} : memref<8x256xbf16, #tpu.memory_space<vmem>>, vector<8x128xbf16>,
      %c0_48 = arith.constant 0 : index
      %c0_49 = arith.constant 0 : index
      %66 = vector.load %arg8[%c0_48, %c0_49] : memref<8x256xbf16, #tpu.memory_space<vmem>>, vector<8x256xbf16>
      %c1_50 = arith.constant 1 : index
      %c0_51 = arith.constant 0 : index
      %c0_52 = arith.constant 0 : index
      %67 = vector.load %arg4[%c1_50, %c0_51, %c0_52] : memref<2x256x128xbf16, #tpu.memory_space<vmem>>, vector<1x256x128xbf16>
      %68 = vector.shape_cast %67 : vector<1x256x128xbf16> to vector<256x128xbf16>
      %cst_53 = arith.constant dense<0.000000e+00> : vector<8x128xf32>
      %69 = tpu.matmul %66, %68, %cst_53 {dimension_numbers = #tpu.dot_dimension_numbers<[1], [0], [0], [1], [0, 0, 1, 1], [], []>} : vector<8x256xbf16>, vector<256x128xbf16>, vector<8x128xf32> -> vector<8x128xf32>
      %70 = arith.addf %69, %14 : vector<8x128xf32>
      %71 = math.tanh %70 : vector<8x128xf32>
      %c2_54 = arith.constant 2 : index
      %c0_55 = arith.constant 0 : index
      %c0_56 = arith.constant 0 : index
      %72 = vector.load %arg7[%c2_54, %c0_55, %c0_56] : memref<3x8x128xf32, #tpu.memory_space<vmem>>, vector<1x8x128xf32>
      %73 = vector.shape_cast %72 : vector<1x8x128xf32> to vector<8x128xf32>
      %74 = vector.shape_cast %71 : vector<8x128xf32> to vector<1x8x128xf32>
      tpu.vector_store %arg7[%c2_54, %c0_55, %c0_56], %74 {strides = array<i32>} : memref<3x8x128xf32, #tpu.memory_space<vmem>>, vector<1x8x128xf32>,
      %75 = arith.truncf %71 : vector<8x128xf32> to vector<8x128xbf16>
      %76 = arith.index_cast %c1_i32 : i32 to index
      %c0_57 = arith.constant 0 : index
      %c0_58 = arith.constant 0 : index
      %77 = vector.load %arg6[%76, %c0_57, %c0_58] : memref<3x8x128xbf16, #tpu.memory_space<vmem>>, vector<1x8x128xbf16>
      %78 = vector.shape_cast %77 : vector<1x8x128xbf16> to vector<8x128xbf16>
      %79 = vector.shape_cast %75 : vector<8x128xbf16> to vector<1x8x128xbf16>
      tpu.vector_store %arg6[%76, %c0_57, %c0_58], %79 {strides = array<i32>} : memref<3x8x128xbf16, #tpu.memory_space<vmem>>, vector<1x8x128xbf16>,
    } else {
    }
    %c2_i32 = arith.constant 2 : i32
    %c3_i32_12 = arith.constant 3 : i32
    %25 = arith.muli %arg0, %c3_i32_12 : i32
    %26 = arith.addi %25, %c2_i32 : i32
    %c8_i32_13 = arith.constant 8 : i32
    %27 = arith.cmpi slt, %26, %c8_i32_13 : i32
    %28 = arith.extui %27 : i1 to i32
    %c0_i32_14 = arith.constant 0 : i32
    %29 = arith.cmpi ne, %28, %c0_i32_14 : i32
    scf.if %29 {
      %c0_16 = arith.constant 0 : index
      %c0_17 = arith.constant 0 : index
      %c0_18 = arith.constant 0 : index
      %30 = vector.load %arg7[%c0_16, %c0_17, %c0_18] : memref<3x8x128xf32, #tpu.memory_space<vmem>>, vector<1x8x128xf32>
      %31 = vector.shape_cast %30 : vector<1x8x128xf32> to vector<8x128xf32>
      %32 = arith.index_cast %c2_i32 : i32 to index
      %c0_19 = arith.constant 0 : index
      %c0_20 = arith.constant 0 : index
      %33 = vector.load %arg1[%32, %c0_19, %c0_20] : memref<3x8x128xbf16, #tpu.memory_space<vmem>>, vector<1x8x128xbf16>
      %34 = vector.shape_cast %33 : vector<1x8x128xbf16> to vector<8x128xbf16>
      %35 = arith.extf %34 : vector<8x128xbf16> to vector<8x128xf32>
      %36 = arith.truncf %31 : vector<8x128xf32> to vector<8x128xbf16>
      %c0_21 = arith.constant 0 : index
      %c0_22 = arith.constant 0 : index
      %37 = vector.load %arg3[%c0_21, %c0_22] : memref<128x128xbf16, #tpu.memory_space<vmem>>, vector<128x128xbf16>
      %cst = arith.constant dense<0.000000e+00> : vector<8x128xf32>
      %38 = tpu.matmul %36, %37, %cst {dimension_numbers = #tpu.dot_dimension_numbers<[1], [0], [0], [1], [0, 0, 1, 1], [], []>} : vector<8x128xbf16>, vector<128x128xbf16>, vector<8x128xf32> -> vector<8x128xf32>
      %39 = arith.addf %35, %38 : vector<8x128xf32>
      %40 = arith.addf %39, %6 : vector<8x128xf32>
      %41 = math.tanh %40 : vector<8x128xf32>
      %c0_23 = arith.constant 0 : index
      %c0_24 = arith.constant 0 : index
      %c0_25 = arith.constant 0 : index
      %42 = vector.load %arg7[%c0_23, %c0_24, %c0_25] : memref<3x8x128xf32, #tpu.memory_space<vmem>>, vector<1x8x128xf32>
      %43 = vector.shape_cast %42 : vector<1x8x128xf32> to vector<8x128xf32>
      %44 = vector.shape_cast %41 : vector<8x128xf32> to vector<1x8x128xf32>
      tpu.vector_store %arg7[%c0_23, %c0_24, %c0_25], %44 {strides = array<i32>} : memref<3x8x128xf32, #tpu.memory_space<vmem>>, vector<1x8x128xf32>,
      %45 = arith.truncf %41 : vector<8x128xf32> to vector<8x128xbf16>
      %c0_26 = arith.constant 0 : index
      %c0_27 = arith.constant 0 : index
      %46 = vector.load %arg8[%c0_26, %c0_27] : memref<8x256xbf16, #tpu.memory_space<vmem>>, vector<8x128xbf16>
      tpu.vector_store %arg8[%c0_26, %c0_27], %45 {strides = array<i32>} : memref<8x256xbf16, #tpu.memory_space<vmem>>, vector<8x128xbf16>,
      %c1_28 = arith.constant 1 : index
      %c0_29 = arith.constant 0 : index
      %c0_30 = arith.constant 0 : index
      %47 = vector.load %arg7[%c1_28, %c0_29, %c0_30] : memref<3x8x128xf32, #tpu.memory_space<vmem>>, vector<1x8x128xf32>
      %48 = vector.shape_cast %47 : vector<1x8x128xf32> to vector<8x128xf32>
      %49 = arith.truncf %48 : vector<8x128xf32> to vector<8x128xbf16>
      %c0_31 = arith.constant 0 : index
      %c128 = arith.constant 128 : index
      %50 = vector.load %arg8[%c0_31, %c128] : memref<8x256xbf16, #tpu.memory_space<vmem>>, vector<8x128xbf16>
      tpu.vector_store %arg8[%c0_31, %c128], %49 {strides = array<i32>} : memref<8x256xbf16, #tpu.memory_space<vmem>>, vector<8x128xbf16>,
      %c0_32 = arith.constant 0 : index
      %c0_33 = arith.constant 0 : index
      %51 = vector.load %arg8[%c0_32, %c0_33] : memref<8x256xbf16, #tpu.memory_space<vmem>>, vector<8x256xbf16>
      %c0_34 = arith.constant 0 : index
      %c0_35 = arith.constant 0 : index
      %c0_36 = arith.constant 0 : index
      %52 = vector.load %arg4[%c0_34, %c0_35, %c0_36] : memref<2x256x128xbf16, #tpu.memory_space<vmem>>, vector<1x256x128xbf16>
      %53 = vector.shape_cast %52 : vector<1x256x128xbf16> to vector<256x128xbf16>
      %cst_37 = arith.constant dense<0.000000e+00> : vector<8x128xf32>
      %54 = tpu.matmul %51, %53, %cst_37 {dimension_numbers = #tpu.dot_dimension_numbers<[1], [0], [0], [1], [0, 0, 1, 1], [], []>} : vector<8x256xbf16>, vector<256x128xbf16>, vector<8x128xf32> -> vector<8x128xf32>
      %55 = arith.addf %54, %10 : vector<8x128xf32>
      %56 = math.tanh %55 : vector<8x128xf32>
      %c1_38 = arith.constant 1 : index
      %c0_39 = arith.constant 0 : index
      %c0_40 = arith.constant 0 : index
      %57 = vector.load %arg7[%c1_38, %c0_39, %c0_40] : memref<3x8x128xf32, #tpu.memory_space<vmem>>, vector<1x8x128xf32>
      %58 = vector.shape_cast %57 : vector<1x8x128xf32> to vector<8x128xf32>
      %59 = vector.shape_cast %56 : vector<8x128xf32> to vector<1x8x128xf32>
      tpu.vector_store %arg7[%c1_38, %c0_39, %c0_40], %59 {strides = array<i32>} : memref<3x8x128xf32, #tpu.memory_space<vmem>>, vector<1x8x128xf32>,
      %60 = arith.truncf %56 : vector<8x128xf32> to vector<8x128xbf16>
      %c0_41 = arith.constant 0 : index
      %c0_42 = arith.constant 0 : index
      %61 = vector.load %arg8[%c0_41, %c0_42] : memref<8x256xbf16, #tpu.memory_space<vmem>>, vector<8x128xbf16>
      tpu.vector_store %arg8[%c0_41, %c0_42], %60 {strides = array<i32>} : memref<8x256xbf16, #tpu.memory_space<vmem>>, vector<8x128xbf16>,
      %c2_43 = arith.constant 2 : index
      %c0_44 = arith.constant 0 : index
      %c0_45 = arith.constant 0 : index
      %62 = vector.load %arg7[%c2_43, %c0_44, %c0_45] : memref<3x8x128xf32, #tpu.memory_space<vmem>>, vector<1x8x128xf32>
      %63 = vector.shape_cast %62 : vector<1x8x128xf32> to vector<8x128xf32>
      %64 = arith.truncf %63 : vector<8x128xf32> to vector<8x128xbf16>
      %c0_46 = arith.constant 0 : index
      %c128_47 = arith.constant 128 : index
      %65 = vector.load %arg8[%c0_46, %c128_47] : memref<8x256xbf16, #tpu.memory_space<vmem>>, vector<8x128xbf16>
      tpu.vector_store %arg8[%c0_46, %c128_47], %64 {strides = array<i32>} : memref<8x256xbf16, #tpu.memory_space<vmem>>, vector<8x128xbf16>,
      %c0_48 = arith.constant 0 : index
      %c0_49 = arith.constant 0 : index
      %66 = vector.load %arg8[%c0_48, %c0_49] : memref<8x256xbf16, #tpu.memory_space<vmem>>, vector<8x256xbf16>
      %c1_50 = arith.constant 1 : index
      %c0_51 = arith.constant 0 : index
      %c0_52 = arith.constant 0 : index
      %67 = vector.load %arg4[%c1_50, %c0_51, %c0_52] : memref<2x256x128xbf16, #tpu.memory_space<vmem>>, vector<1x256x128xbf16>
      %68 = vector.shape_cast %67 : vector<1x256x128xbf16> to vector<256x128xbf16>
      %cst_53 = arith.constant dense<0.000000e+00> : vector<8x128xf32>
      %69 = tpu.matmul %66, %68, %cst_53 {dimension_numbers = #tpu.dot_dimension_numbers<[1], [0], [0], [1], [0, 0, 1, 1], [], []>} : vector<8x256xbf16>, vector<256x128xbf16>, vector<8x128xf32> -> vector<8x128xf32>
      %70 = arith.addf %69, %14 : vector<8x128xf32>
      %71 = math.tanh %70 : vector<8x128xf32>
      %c2_54 = arith.constant 2 : index
      %c0_55 = arith.constant 0 : index
      %c0_56 = arith.constant 0 : index
      %72 = vector.load %arg7[%c2_54, %c0_55, %c0_56] : memref<3x8x128xf32, #tpu.memory_space<vmem>>, vector<1x8x128xf32>
      %73 = vector.shape_cast %72 : vector<1x8x128xf32> to vector<8x128xf32>
      %74 = vector.shape_cast %71 : vector<8x128xf32> to vector<1x8x128xf32>
      tpu.vector_store %arg7[%c2_54, %c0_55, %c0_56], %74 {strides = array<i32>} : memref<3x8x128xf32, #tpu.memory_space<vmem>>, vector<1x8x128xf32>,
      %75 = arith.truncf %71 : vector<8x128xf32> to vector<8x128xbf16>
      %76 = arith.index_cast %c2_i32 : i32 to index
      %c0_57 = arith.constant 0 : index
      %c0_58 = arith.constant 0 : index
      %77 = vector.load %arg6[%76, %c0_57, %c0_58] : memref<3x8x128xbf16, #tpu.memory_space<vmem>>, vector<1x8x128xbf16>
      %78 = vector.shape_cast %77 : vector<1x8x128xbf16> to vector<8x128xbf16>
      %79 = vector.shape_cast %75 : vector<8x128xbf16> to vector<1x8x128xbf16>
      tpu.vector_store %arg6[%76, %c0_57, %c0_58], %79 {strides = array<i32>} : memref<3x8x128xbf16, #tpu.memory_space<vmem>>, vector<1x8x128xbf16>,
    } else {
    }
    %c3_i32_15 = arith.constant 3 : i32
    return
  }
  func.func @transform_0(%arg0: i32) -> (i32, i32, i32) {
    %c0_i32 = arith.constant 0 : i32
    %c0_i32_0 = arith.constant 0 : i32
    %c0_i32_1 = arith.constant 0 : i32
    return %arg0, %c0_i32, %c0_i32_0 : i32, i32, i32
  }
  func.func @transform_1(%arg0: i32) -> (i32, i32, i32) {
    %c0_i32 = arith.constant 0 : i32
    %c0_i32_0 = arith.constant 0 : i32
    %c0_i32_1 = arith.constant 0 : i32
    %c0_i32_2 = arith.constant 0 : i32
    return %c0_i32, %c0_i32_0, %c0_i32_1 : i32, i32, i32
  }
  func.func @transform_2(%arg0: i32) -> (i32, i32) {
    %c0_i32 = arith.constant 0 : i32
    %c0_i32_0 = arith.constant 0 : i32
    %c0_i32_1 = arith.constant 0 : i32
    return %c0_i32, %c0_i32_0 : i32, i32
  }
  func.func @transform_3(%arg0: i32) -> (i32, i32, i32) {
    %c0_i32 = arith.constant 0 : i32
    %c0_i32_0 = arith.constant 0 : i32
    %c0_i32_1 = arith.constant 0 : i32
    %c0_i32_2 = arith.constant 0 : i32
    return %c0_i32, %c0_i32_0, %c0_i32_1 : i32, i32, i32
  }
  func.func @transform_4(%arg0: i32) -> (i32, i32, i32) {
    %c0_i32 = arith.constant 0 : i32
    %c0_i32_0 = arith.constant 0 : i32
    %c0_i32_1 = arith.constant 0 : i32
    %c0_i32_2 = arith.constant 0 : i32
    return %c0_i32, %c0_i32_0, %c0_i32_1 : i32, i32, i32
  }
  func.func @transform_5(%arg0: i32) -> (i32, i32, i32) {
    %c0_i32 = arith.constant 0 : i32
    %c0_i32_0 = arith.constant 0 : i32
    %c0_i32_1 = arith.constant 0 : i32
    return %arg0, %c0_i32, %c0_i32_0 : i32, i32, i32
  }
  func.func @transform_6(%arg0: i32) -> (i32, i32, i32) {
    %c0_i32 = arith.constant 0 : i32
    %c0_i32_0 = arith.constant 0 : i32
    %c0_i32_1 = arith.constant 0 : i32
    %c0_i32_2 = arith.constant 0 : i32
    return %c0_i32, %c0_i32_0, %c0_i32_1 : i32, i32, i32
  }
}

</mosaic_0001>

<bundles_post_ra>
// kernel: tpu_custom_call.1
= control target key start
LH: loop header
LB: loop body
LE: loop exit
PB: predicated region body
PF: predicated region fallthrough
CT: control target
= control target key end

     0   :  { %s3060_s0 = inlined_call_operand.hbm [shape: bf16[9,8,128], index: 0, kind: input, shape index: {}]   ;;  %s3061_s1 = inlined_call_operand.hbm [shape: f32[3,8,128], index: 1, kind: input, shape index: {}]   ;;  %s3062_s2 = inlined_call_operand.hbm [shape: bf16[128,128], index: 2, kind: input, shape index: {}]   ;;  %s3063_s3 = inlined_call_operand.hbm [shape: bf16[2,256,128], index: 3, kind: input, shape index: {}]   ;;  %s3064_s4 = inlined_call_operand.vmem [shape: f32[3,1,128], index: 4, kind: input, shape index: {}]   ;;  %s3065_s5 = inlined_call_operand.hbm [shape: bf16[9,8,128], index: 5, kind: output, shape index: {0}]   ;;  %s3066_s6 = inlined_call_operand.hbm [shape: f32[3,8,128], index: 6, kind: output, shape index: {1}]  }
   0x1   :  { %3070 = sst [smem:[#allocation19_spill]] %s3061_s1 }
   0x2   :  { %3071 = sst [smem:[#allocation20_spill]] %s3062_s2 }
   0x3   :  { %12 = vsyncpa [#allocation4], 0 }
   0x4   :  { %14 = vsyncpa [#allocation4 + $0x1], 0 }
   0x5   :  { %15 = vsyncpa [#allocation7], 0 }
   0x6   :  { %16 = vsyncpa [#allocation10], 0 }
   0x7   :  { %17 = vsyncpa [#allocation5], 0 }
   0x8   :  { %19 = vsyncpa [#allocation5 + $0x1], 0 }
   0x9   :  { %20 = vsyncpa [#allocation13], 0  ;;  %s2842_s21 = smov 0   ;;  %s2844_s22 = smov 0  }
   0xa   :  { %s2846_s23 = smov 0   ;;  %s2848_s24 = smov 0  }
   0xb LB: > { %s2863_s25 = sadd.s32 4294967295, %s2793_s24   ;;  %s1794_s26 = sadd.s32 4294967294, %s2793_s24   ;;  %s2793_s24 = sphi %s2848_s24, %s3089_s24   ;;  %s2789_s23 = sphi %s2846_s23, %s3088_s23   ;;  %s2785_s22 = sphi %s2844_s22, %s3087_s22   ;;  %s2781_s21 = sphi %s2842_s21, %s3086_s21  }
   0xc   : > { %p46_p0 = scmp.ne.s32.totalorder %s2785_s22, %s2781_s21  ;;  %p47_p1 = scmp.eq.s32.totalorder %s2863_s25, 0 }
   0xd   : > { %p3069_p2 = scmp.eq.s32.totalorder %s2863_s25, 2  ;;  %p160_p3 = scmp.eq.s32.totalorder %s1794_s26, 2 }
   0xe   : > { %p2872_p4 = por %p47_p1, %p46_p0  ;;  %p1795_p5 = scmp.ge.s32.totalorder %s2793_s24, 1 }
   0xf   : > { %p2877_p6 = por %p160_p3, %p46_p0  ;;  %p188_p7 = scmp.lt.s32.totalorder %s2793_s24, 4 }
  0x10   : > { %s3074_s1 = sld [smem:[#allocation19_spill]]  ;;  %s2795_s9 = smov [#allocation6]  }
  0x11   : > { %p2886_p9 = pnand %p1795_p5, %p188_p7  ;;  %s201_s10 = sshll.u32 %s2795_s9, 4  ;;  %s202_s10 = int_to_ptr.vmem [resolvable:$true] %s201_s10 }
  0x12   : > { %s3077_s2 = sld [smem:[#allocation20_spill]]  ;;  %s2796_s15 = smov 128  }
  0x13   : > { %p2474_p10 = pneg %p2886_p9  ;;  %s2797_s16 = smov 8  }
  0x14   : > { %s2798_s17 = smov [#allocation8]   ;;  %s3067_s19 = smov 64  }
  0x15   : > { %p2894_p11 = pnand %p2474_p10, %p47_p1  ;;  %s215_s18 = sshll.u32 %s2798_s17, 4  ;;  %s216_s18 = int_to_ptr.vmem [resolvable:$true] %s215_s18 }
  0x16   : > { %s199_s7 = sshll.u32 %s3074_s1, 4  ;;  %s3068_s20 = smov 4   ;;  %s200_s7 = int_to_ptr.hbm [resolvable:$true] %s199_s7 }
  0x17   : > { %2477 = dma.hbm_to_vmem [thread:$0]  (!%p2894_p11), %s200_s7, 384, %s202_s10, [#allocation7], %s2796_s15, %s2796_s15, %s2797_s16  }
  0x18   : > { %s213_s14 = sshll.u32 %s3077_s2, 4  ;;  %s227_s30 = sshll.u32 %s3063_s3, 4  ;;  %s214_s14 = int_to_ptr.hbm [resolvable:$true] %s213_s14  ;;  %s228_s30 = int_to_ptr.hbm [resolvable:$true] %s227_s30 }
  0x19   : > { %2480 = dma.hbm_to_vmem [thread:$0]  (!%p2894_p11), %s214_s14, 1024, %s216_s18, [#allocation7], %s3067_s19, %s3067_s19, %s3068_s20  }
  0x1a   : > { %s2801_s7 = smov [#allocation9]   ;;  %s2917_s10 = sadd.s32 1, %s2793_s24  }
  0x1b   : > { %s229_s9 = sshll.u32 %s2801_s7, 4  ;;  %s30_s12 = ssub.s32 %s2793_s24, %s2917_s10  ;;  %s230_s9 = int_to_ptr.vmem [resolvable:$true] %s229_s9 }
  0x1c   : > { %2483 = dma.hbm_to_vmem [thread:$0]  (!%p2894_p11), %s228_s30, 4096, %s230_s9, [#allocation10], %s3067_s19, %s3067_s19, %s3068_s20  }
  0x1d   : > { %s33_s13 = sadd.s32 1, %s2789_s23  ;;  %p31_p12 = scmp.eq.s32.totalorder %s30_s12, 0 }
  0x1e   : > { %p40_p13 = scmp.ne.s32.totalorder %s2789_s23, %s2785_s22  ;;  %p41_p0 = scmp.eq.s32.totalorder %s2793_s24, 0 }
  0x1f   : > { %p2495_p3 = scmp.lt.s32.totalorder %s2793_s24, 3  ;;  %s246_s11 = sand.u32 1, %s2789_s23  }
  0x20   : > { %s2927_s14 = scalar_select %p31_p12, %s2789_s23, %s33_s13  }
  0x21   : > { %p42_p5 = por %p41_p0, %p40_p13  ;;  %p2931_p7 = por %p3069_p2, %p40_p13 }
  0x22   : > { %s2300_s16 = smul.u32 12, %s2793_s24  ;;  %s247_s13 = scalar_lea.sflag [#allocation4], %s246_s11 }
  0x23   : > { %s2452_s17 = smul.u32 12, %s246_s11  ;;  %p2940_p10 = pnand %p2495_p3, %p42_p5 }
  0x24   : > { %s255_s29 = scalar_lea.hbm %s3060_s0, %s2300_s16  ;;  %s2664_s26 = scalar_lea.hbm %s3060_s0, 36 }
  0x25   : > { %s256_s7 = sshll.u32 %s255_s29, 4  ;;  %s250_s9 = scalar_lea.vmem [#allocation3], %s2452_s17  ;;  %s257_s7 = int_to_ptr.hbm [resolvable:$true] %s256_s7 }
  0x26   : > { %s258_s12 = sshll.u32 %s250_s9, 4  ;;  %s2657_s19 = sshra.s32 %s257_s7, 4  ;;  %s259_s12 = int_to_ptr.vmem [resolvable:$true] %s258_s12  ;;  %s2658_s19 = int_to_ptr.hbm [resolvable:$true] %s2657_s19 }
  0x27   : > { %s2659_s20 = scalar_lea.hbm %s2658_s19, 12  ;;  %p2661_p12 = pneg %p2940_p10 }
  0x28   : > { %p2660_p11 = scmp.ne.s32.totalorder %s2658_s19, %s2659_s20  ;;  %p2665_p3 = scmp.lt.s32.totalorder %s2658_s19, %s3060_s0 }
  0x29   : > { %p2666_p5 = scmp.lt.s32.totalorder %s2664_s26, %s2659_s20 }
  0x2a   : > { %p2662_p13 = pnand %p2661_p12, %p2660_p11 }
  0x2b   : > { %p2667_p2 = por %p2666_p5, %p2665_p3 }
  0x2c   : > { %p2663_p0 = pneg %p2662_p13 }
  0x2e   : > { %p2668_p8 = pnand %p2667_p2, %p2663_p0 }
  0x30   : > { %2671 = shalt.err (!%p2668_p8)
}
  0x31   : > { %s3080_s11 = smov 4   ;;  %s3081_s17 = smov 64  }
  0x32   : > { %2487 = dma.hbm_to_vmem [thread:$0]  (!%p2940_p10), %s257_s7, 192, %s259_s12, %s247_s13, %s3081_s17, %s3081_s17, %s3080_s11  }
  0x33   : > { %270 = sbr.rel (%p2886_p9) target bundleno = 1529 (0x5f9), region = 40  ;;  %s2960_s29 = sand.u32 (!%p2886_p9), 1, %s2785_s22  }
  0x34   : > { %s2453_s1 = smul.u32 (!%p2886_p9), 12, %s2960_s29  ;;  %s273_s2 = scalar_lea.sflag (!%p2886_p9), [#allocation4], %s2960_s29 }
  0x36   : > { %s2964_s19 = scalar_lea.vmem (!%p2886_p9), [#allocation3], %s2453_s1 }
  0x38   : > { %2760 = dma.done.wait (%p2872_p4), %s273_s2, 192  }
  0x39   : > { %2762 = vsyncadd (%p2872_p4), %s273_s2, 4294967104 }
  0x3a   : > { %2764 = dma.done.wait (%p47_p1), [#allocation7], 1408  }
  0x3b   : > { %2766 = vsyncadd (%p47_p1), [#allocation7], 4294965888 }
  0x3c   : > { %2768 = dma.done.wait (%p47_p1), [#allocation10], 4096  }
  0x3d   : > { %2770 = vsyncadd (%p47_p1), [#allocation10], 4294963200  ;;  %s2978_s8 = scalar_lea.vmem [#allocation11], %s2453_s1  ;;  %p3082_p2 = scmp.ne.s32.totalorder %s2863_s25, 0 }
  0x3f   : > { %326 = sbr.rel (%p3082_p2) target bundleno = 72 (0x48), region = 60 }
  0x44   : > { %v327_v0 = vld [vmem:[#allocation6] sm:$0xff]  ;;  %v328_v1 = vld [vmem:[#allocation6 + $0x8] sm:$0xff]  ;;  %v329_v2 = vld [vmem:[#allocation6 + $0x10] sm:$0xff] }
  0x45   : > { %330 = vst [vmem:[#allocation12] sm:$0xff] %v327_v0 }
  0x46   : > { %331 = vst [vmem:[#allocation12 + $0x8] sm:$0xff] %v328_v1 }
  0x47   : > { %332 = vst [vmem:[#allocation12 + $0x10] sm:$0xff] %v329_v2 }
  0x48 PF: > { %v2985_v3 = vld [vmem:[%s3064_s4] ss:$0 sm:$0xff]  ;;  %v2990_v4 = vld [vmem:[%s3064_s4 + $0x1] ss:$0 sm:$0xff]  ;;  %v2995_v5 = vld [vmem:[%s3064_s4 + $0x2] ss:$0 sm:$0xff] }
  0x49   : > { %s2998_s13 = smul.u32 3, %s2863_s25 }
  0x4b   : > { %p1808_p1 = scmp.ge.s32.totalorder %s2998_s13, 8 }
  0x4d   : > { %351 = sbr.rel (%p1808_p1) target bundleno = 550 (0x226), region = 64 }
  0x52   : > { %v2308_v6 = vld [vmem:[#allocation8 + $0x38] sm:$0xff]  ;;  %v2307_v7 = vld [vmem:[#allocation8 + $0x30] sm:$0xff]  ;;  %v2306_v12 = vld [vmem:[#allocation8 + $0x28] sm:$0xff] }
  0x53   : > { %420 = vmatpush.bf16.msra.mxu0 %v2308_v6  ;;  %v2316_v8 = vld [vmem:[#allocation9 + $0x38] sm:$0xff]  ;;  %v2315_v10 = vld [vmem:[#allocation9 + $0x30] sm:$0xff]  ;;  %v2305_v13 = vld [vmem:[#allocation8 + $0x20] sm:$0xff] }
  0x54   : > { %v2324_v9 = vld [vmem:[#allocation9 + $0x78] sm:$0xff]  ;;  %579 = vmatpush.bf16.msra.mxu1 %v2316_v8  ;;  %v2323_v11 = vld [vmem:[#allocation9 + $0x70] sm:$0xff]  ;;  %v2302_v16 = vld [vmem:[#allocation8 + $0x8] sm:$0xff] }
  0x55   : > { %592 = vmatpush.bf16.msra.mxu2 %v2324_v9  ;;  %v2304_v14 = vld [vmem:[#allocation8 + $0x18] sm:$0xff]  ;;  %v2303_v15 = vld [vmem:[#allocation8 + $0x10] sm:$0xff]  ;;  %v2301_v17 = vld [vmem:[#allocation8] sm:$0xff] }
  0x56   : > { %v352_v18 = vld [vmem:[#allocation12] sm:$0xff]  ;;  %v2314_v20 = vld [vmem:[#allocation9 + $0x28] sm:$0xff]  ;;  %v2313_v22 = vld [vmem:[#allocation9 + $0x20] sm:$0xff] }
  0x57   : > { %421 = vmatpush.bf16.msra.mxu0 %v2307_v7  ;;  %v355_v19 = vpack.c.bf16 %v352_v18, %v352_v18  ;;  %v2322_v21 = vld [vmem:[#allocation9 + $0x68] sm:$0xff]  ;;  %v2321_v23 = vld [vmem:[#allocation9 + $0x60] sm:$0xff]  ;;  %v2312_v24 = vld [vmem:[#allocation9 + $0x18] sm:$0xff] }
  0x58   : > { %580 = vmatpush.bf16.msra.mxu1 %v2315_v10  ;;  %v2320_v25 = vld [vmem:[#allocation9 + $0x58] sm:$0xff]  ;;  %v2311_v26 = vld [vmem:[#allocation9 + $0x10] sm:$0xff]  ;;  %v2310_v28 = vld [vmem:[#allocation9 + $0x8] sm:$0xff] }
  0x59   : > { %593 = vmatpush.bf16.msra.mxu2 %v2323_v11  ;;  %v2319_v27 = vld [vmem:[#allocation9 + $0x50] sm:$0xff]  ;;  %v2318_v29 = vld [vmem:[#allocation9 + $0x48] sm:$0xff]  ;;  %v2309_v30 = vld [vmem:[#allocation9] sm:$0xff] }
  0x5a   : > { %v2317_v31 = vld [vmem:[#allocation9 + $0x40] sm:$0xff]  ;;  %v2332_v32 = vld [vmem:[#allocation9 + $0xb8] sm:$0xff]  ;;  %v2331_v47 = vld [vmem:[#allocation9 + $0xb0] sm:$0xff] }
  0x5b   : > { %422 = vmatpush.bf16.msra.mxu0 %v2306_v12  ;;  %v2340_v33 = vld [vmem:[#allocation9 + $0xf8] sm:$0xff]  ;;  %750 = vmatpush.bf16.msra.mxu3 %v2332_v32  ;;  %v440_v40 = vld [vmem:[#allocation12 + $0x8] sm:$0xff]  ;;  %v2339_v48 = vld [vmem:[#allocation9 + $0xf0] sm:$0xff] }
  0x5c   : > { %581 = vmatpush.bf16.msra.mxu1 %v2314_v20  ;;  %v353_v34 = vld [vmem:[%s2964_s19] sm:$0xf]  ;;  %v2330_v49 = vld [vmem:[#allocation9 + $0xa8] sm:$0xff]  ;;  %v2329_v51 = vld [vmem:[#allocation9 + $0xa0] sm:$0xff] }
  0x5d   : > { %594 = vmatpush.bf16.msra.mxu2 %v2322_v21  ;;  %v354_v35 = vunpack.c.l.bf16 %v353_v34  ;;  %v2338_v50 = vld [vmem:[#allocation9 + $0xe8] sm:$0xff]  ;;  %v2337_v52 = vld [vmem:[#allocation9 + $0xe0] sm:$0xff]  ;;  %v2328_v53 = vld [vmem:[#allocation9 + $0x98] sm:$0xff] }
  0x5e   : > { %v2336_v54 = vld [vmem:[#allocation9 + $0xd8] sm:$0xff]  ;;  %v2327_v55 = vld [vmem:[#allocation9 + $0x90] sm:$0xff]  ;;  %v2326_v57 = vld [vmem:[#allocation9 + $0x88] sm:$0xff] }
  0x5f   : > { %423 = vmatpush.bf16.msra.mxu0 %v2305_v13  ;;  %751 = vmatpush.bf16.msra.mxu3 %v2331_v47  ;;  %v2335_v56 = vld [vmem:[#allocation9 + $0xd0] sm:$0xff]  ;;  %v2334_v58 = vld [vmem:[#allocation9 + $0xc8] sm:$0xff]  ;;  %v2325_v59 = vld [vmem:[#allocation9 + $0x80] sm:$0xff] }
  0x60   : > { %582 = vmatpush.bf16.msra.mxu1 %v2313_v22  ;;  %v2333_v60 = vld [vmem:[#allocation9 + $0xc0] sm:$0xff]  ;;  %v610_v2 = vld [vmem:[#allocation12 + $0x10] sm:$0xff] }
  0x61   : > { %595 = vmatpush.bf16.msra.mxu2 %v2321_v23 }
  0x63   : > { %424 = vmatpush.bf16.msra.mxu0 %v2304_v14  ;;  %752 = vmatpush.bf16.msra.mxu3 %v2330_v49 }
  0x64   : > { %583 = vmatpush.bf16.msra.mxu1 %v2312_v24 }
  0x65   : > { %596 = vmatpush.bf16.msra.mxu2 %v2320_v25 }
  0x67   : > { %425 = vmatpush.bf16.msra.mxu0 %v2303_v15  ;;  %753 = vmatpush.bf16.msra.mxu3 %v2329_v51 }
  0x68   : > { %584 = vmatpush.bf16.msra.mxu1 %v2311_v26 }
  0x69   : > { %597 = vmatpush.bf16.msra.mxu2 %v2319_v27 }
  0x6b   : > { %426 = vmatpush.bf16.msra.mxu0 %v2302_v16  ;;  %754 = vmatpush.bf16.msra.mxu3 %v2328_v53 }
  0x6c   : > { %585 = vmatpush.bf16.msra.mxu1 %v2310_v28 }
  0x6d   : > { %598 = vmatpush.bf16.msra.mxu2 %v2318_v29 }
  0x6f   : > { %427 = vmatpush.bf16.msra.mxu0 %v2301_v17  ;;  %755 = vmatpush.bf16.msra.mxu3 %v2327_v55 }
  0x70   : > { %586 = vmatpush.bf16.msra.mxu1 %v2309_v30 }
  0x71   : > { %599 = vmatpush.bf16.msra.mxu2 %v2317_v31 }
  0x72   : > { %428 = vmatmul.bf16.vlgmr.msra.gmra.mxu0 %v355_v19 }
  0x73   : > { %763 = vmatpush.bf16.msrb.mxu0 %v2340_v33  ;;  %756 = vmatpush.bf16.msra.mxu3 %v2326_v57 }
  0x77   : > { %764 = vmatpush.bf16.msrb.mxu0 %v2339_v48  ;;  %757 = vmatpush.bf16.msra.mxu3 %v2325_v59 }
  0x7b   : > { %765 = vmatpush.bf16.msrb.mxu0 %v2338_v50 }
  0x7f   : > { %766 = vmatpush.bf16.msrb.mxu0 %v2337_v52 }
  0x83   : > { %767 = vmatpush.bf16.msrb.mxu0 %v2336_v54 }
  0x87   : > { %768 = vmatpush.bf16.msrb.mxu0 %v2335_v56 }
  0x8b   : > { %769 = vmatpush.bf16.msrb.mxu0 %v2334_v58 }
  0x8f   : > { %770 = vmatpush.bf16.msrb.mxu0 %v2333_v60 }
  0xef   : > { %v429_v36 = vpop.f32.mrf.mxu0 }
  0xf0   : > { %v433_v37 = vadd.f32 %v429_v36, %v354_v35 }
  0xf2   : > { %v434_v38 = vadd.f32 %v2985_v3, %v433_v37 }
  0xf4   : > { %2549 = vtanh.f32 %v434_v38 }
  0xf7   : > { %v431_v39 = vpop.f32.mrf.mxu0 }
  0xfa   : > { %v2550_v41 = vpop.eup %2549 }
  0xfb   : > { %436 = vst [vmem:[#allocation12] sm:$0xff] %v2550_v41  ;;  %v2425_v42 = vpack.c.bf16 %v440_v40, %v2550_v41 }
  0xfd   : > { %v477_v43 = vunpack.c.l.b16 %v2425_v42  ;;  %v478_v44 = vunpack.c.h.b16 %v2425_v42 }
  0xff   : > { %v479_v45 = vpack.c.b16 %v477_v43, %v477_v43  ;;  %v480_v46 = vpack.c.b16 %v478_v44, %v478_v44 }
 0x101   : > { %587 = vmatmul.bf16.vlgmr.msra.gmra.mxu1 %v479_v45  ;;  %600 = vmatmul.bf16.vlgmr.msra.gmra.mxu2 %v480_v46 }
 0x17e   : > { %v588_v61 = vpop.f32.mrf.mxu1 }
 0x17f   : > { %v589_v62 = vadd.f32 %v2990_v4, %v588_v61 }
 0x184   : > { %v601_v63 = vpop.f32.mrf.mxu2 }
 0x185   : > { %v602_v0 = vadd.f32 %v601_v63, %v589_v62 }
 0x186   : > { %v590_v1 = vpop.f32.mrf.mxu1 }
 0x187   : > { %2551 = vtanh.f32 %v602_v0 }
 0x18c   : > { %v603_v6 = vpop.f32.mrf.mxu2 }
 0x18d   : > { %v2552_v7 = vpop.eup %2551 }
 0x18e   : > { %606 = vst [vmem:[#allocation12 + $0x8] sm:$0xff] %v2552_v7  ;;  %v2430_v8 = vpack.c.bf16 %v610_v2, %v2552_v7 }
 0x190   : > { %v648_v9 = vunpack.c.l.b16 %v2430_v8  ;;  %v649_v10 = vunpack.c.h.b16 %v2430_v8 }
 0x192   : > { %v650_v11 = vpack.c.b16 %v648_v9, %v648_v9  ;;  %v651_v12 = vpack.c.b16 %v649_v10, %v649_v10 }
 0x194   : > { %758 = vmatmul.bf16.vlgmr.msra.gmra.mxu3 %v650_v11  ;;  %771 = vmatmul.bf16.vlgmr.msrb.gmra.mxu0 %v651_v12 }
 0x211   : > { %v772_v13 = vpop.f32.mrf.mxu0 }
 0x217   : > { %v759_v14 = vpop.f32.mrf.mxu3 }
 0x218   : > { %v760_v15 = vadd.f32 %v2995_v5, %v759_v14 }
 0x219   : > { %v774_v16 = vpop.f32.mrf.mxu0 }
 0x21a   : > { %v773_v17 = vadd.f32 %v772_v13, %v760_v15 }
 0x21c   : > { %2553 = vtanh.f32 %v773_v17 }
 0x21f   : > { %v761_v18 = vpop.f32.mrf.mxu3 }
 0x222   : > { %v2554_v19 = vpop.eup %2553 }
 0x223   : > { %777 = vst [vmem:[#allocation12 + $0x10] sm:$0xff] %v2554_v19  ;;  %v778_v20 = vpack.c.bf16 %v2554_v19, %v2554_v19 }
 0x225   : > { %779 = vst [vmem:[%s2978_s8] sm:$0xf] %v778_v20 }
 0x226 PF: > { %s780_s16 = sadd.s32 1, %s2998_s13 }
 0x227   : > { %p1969_p4 = scmp.ge.s32.totalorder %s780_s16, 8 }
 0x229   : > { %784 = sbr.rel (%p1969_p4) target bundleno = 1026 (0x402), region = 68 }
 0x22e   : > { %v2348_v21 = vld [vmem:[#allocation8 + $0x38] sm:$0xff]  ;;  %v2347_v22 = vld [vmem:[#allocation8 + $0x30] sm:$0xff]  ;;  %v2346_v27 = vld [vmem:[#allocation8 + $0x28] sm:$0xff] }
 0x22f   : > { %854 = vmatpush.bf16.msra.mxu0 %v2348_v21  ;;  %v2356_v23 = vld [vmem:[#allocation9 + $0x38] sm:$0xff]  ;;  %v2355_v25 = vld [vmem:[#allocation9 + $0x30] sm:$0xff]  ;;  %v2345_v28 = vld [vmem:[#allocation8 + $0x20] sm:$0xff] }
 0x230   : > { %v2364_v24 = vld [vmem:[#allocation9 + $0x78] sm:$0xff]  ;;  %1013 = vmatpush.bf16.msra.mxu1 %v2356_v23  ;;  %v2363_v26 = vld [vmem:[#allocation9 + $0x70] sm:$0xff]  ;;  %v2342_v31 = vld [vmem:[#allocation8 + $0x8] sm:$0xff] }
 0x231   : > { %1026 = vmatpush.bf16.msra.mxu2 %v2364_v24  ;;  %v2344_v29 = vld [vmem:[#allocation8 + $0x18] sm:$0xff]  ;;  %v2343_v30 = vld [vmem:[#allocation8 + $0x10] sm:$0xff]  ;;  %v2341_v32 = vld [vmem:[#allocation8] sm:$0xff] }
 0x232   : > { %v785_v33 = vld [vmem:[#allocation12] sm:$0xff]  ;;  %v2354_v35 = vld [vmem:[#allocation9 + $0x28] sm:$0xff]  ;;  %v2353_v37 = vld [vmem:[#allocation9 + $0x20] sm:$0xff] }
 0x233   : > { %855 = vmatpush.bf16.msra.mxu0 %v2347_v22  ;;  %v789_v34 = vpack.c.bf16 %v785_v33, %v785_v33  ;;  %v2362_v36 = vld [vmem:[#allocation9 + $0x68] sm:$0xff]  ;;  %v2361_v38 = vld [vmem:[#allocation9 + $0x60] sm:$0xff]  ;;  %v2352_v39 = vld [vmem:[#allocation9 + $0x18] sm:$0xff] }
 0x234   : > { %1014 = vmatpush.bf16.msra.mxu1 %v2355_v25  ;;  %v2360_v40 = vld [vmem:[#allocation9 + $0x58] sm:$0xff]  ;;  %v2351_v41 = vld [vmem:[#allocation9 + $0x10] sm:$0xff]  ;;  %v2350_v43 = vld [vmem:[#allocation9 + $0x8] sm:$0xff] }
 0x235   : > { %1027 = vmatpush.bf16.msra.mxu2 %v2363_v26  ;;  %v2359_v42 = vld [vmem:[#allocation9 + $0x50] sm:$0xff]  ;;  %v2358_v44 = vld [vmem:[#allocation9 + $0x48] sm:$0xff]  ;;  %v2349_v45 = vld [vmem:[#allocation9] sm:$0xff] }
 0x236   : > { %v2357_v46 = vld [vmem:[#allocation9 + $0x40] sm:$0xff]  ;;  %v2372_v47 = vld [vmem:[#allocation9 + $0xb8] sm:$0xff]  ;;  %v2371_v62 = vld [vmem:[#allocation9 + $0xb0] sm:$0xff] }
 0x237   : > { %856 = vmatpush.bf16.msra.mxu0 %v2346_v27  ;;  %v2380_v48 = vld [vmem:[#allocation9 + $0xf8] sm:$0xff]  ;;  %1184 = vmatpush.bf16.msra.mxu3 %v2372_v47  ;;  %v1970_v49 = vld [vmem:[%s2964_s19 + $0x4] sm:$0xf]  ;;  %v2370_v0 = vld [vmem:[#allocation9 + $0xa8] sm:$0xff] }
 0x238   : > { %1015 = vmatpush.bf16.msra.mxu1 %v2354_v35  ;;  %v788_v50 = vunpack.c.l.bf16 %v1970_v49  ;;  %v874_v55 = vld [vmem:[#allocation12 + $0x8] sm:$0xff]  ;;  %v2379_v63 = vld [vmem:[#allocation9 + $0xf0] sm:$0xff]  ;;  %v2378_v1 = vld [vmem:[#allocation9 + $0xe8] sm:$0xff] }
 0x239   : > { %1028 = vmatpush.bf16.msra.mxu2 %v2362_v36  ;;  %v2369_v2 = vld [vmem:[#allocation9 + $0xa0] sm:$0xff]  ;;  %v2368_v7 = vld [vmem:[#allocation9 + $0x98] sm:$0xff]  ;;  %v2367_v9 = vld [vmem:[#allocation9 + $0x90] sm:$0xff] }
 0x23a   : > { %v2377_v6 = vld [vmem:[#allocation9 + $0xe0] sm:$0xff]  ;;  %v2376_v8 = vld [vmem:[#allocation9 + $0xd8] sm:$0xff]  ;;  %v2375_v10 = vld [vmem:[#allocation9 + $0xd0] sm:$0xff] }
 0x23b   : > { %857 = vmatpush.bf16.msra.mxu0 %v2345_v28  ;;  %1185 = vmatpush.bf16.msra.mxu3 %v2371_v62  ;;  %v2366_v11 = vld [vmem:[#allocation9 + $0x88] sm:$0xff]  ;;  %v2365_v13 = vld [vmem:[#allocation9 + $0x80] sm:$0xff] }
 0x23c   : > { %1016 = vmatpush.bf16.msra.mxu1 %v2353_v37  ;;  %v2374_v12 = vld [vmem:[#allocation9 + $0xc8] sm:$0xff]  ;;  %v2373_v14 = vld [vmem:[#allocation9 + $0xc0] sm:$0xff] }
 0x23d   : > { %1029 = vmatpush.bf16.msra.mxu2 %v2361_v38  ;;  %v1044_v20 = vld [vmem:[#allocation12 + $0x10] sm:$0xff] }
 0x23f   : > { %858 = vmatpush.bf16.msra.mxu0 %v2344_v29  ;;  %1186 = vmatpush.bf16.msra.mxu3 %v2370_v0 }
 0x240   : > { %1017 = vmatpush.bf16.msra.mxu1 %v2352_v39 }
 0x241   : > { %1030 = vmatpush.bf16.msra.mxu2 %v2360_v40 }
 0x243   : > { %859 = vmatpush.bf16.msra.mxu0 %v2343_v30  ;;  %1187 = vmatpush.bf16.msra.mxu3 %v2369_v2 }
 0x244   : > { %1018 = vmatpush.bf16.msra.mxu1 %v2351_v41 }
 0x245   : > { %1031 = vmatpush.bf16.msra.mxu2 %v2359_v42 }
 0x247   : > { %860 = vmatpush.bf16.msra.mxu0 %v2342_v31  ;;  %1188 = vmatpush.bf16.msra.mxu3 %v2368_v7 }
 0x248   : > { %1019 = vmatpush.bf16.msra.mxu1 %v2350_v43 }
 0x249   : > { %1032 = vmatpush.bf16.msra.mxu2 %v2358_v44 }
 0x24b   : > { %861 = vmatpush.bf16.msra.mxu0 %v2341_v32  ;;  %1189 = vmatpush.bf16.msra.mxu3 %v2367_v9 }
 0x24c   : > { %1020 = vmatpush.bf16.msra.mxu1 %v2349_v45 }
 0x24d   : > { %1033 = vmatpush.bf16.msra.mxu2 %v2357_v46 }
 0x24e   : > { %862 = vmatmul.bf16.vlgmr.msra.gmra.mxu0 %v789_v34 }
 0x24f   : > { %1197 = vmatpush.bf16.msrb.mxu0 %v2380_v48  ;;  %1190 = vmatpush.bf16.msra.mxu3 %v2366_v11 }
 0x253   : > { %1198 = vmatpush.bf16.msrb.mxu0 %v2379_v63  ;;  %1191 = vmatpush.bf16.msra.mxu3 %v2365_v13 }
 0x257   : > { %1199 = vmatpush.bf16.msrb.mxu0 %v2378_v1 }
 0x25b   : > { %1200 = vmatpush.bf16.msrb.mxu0 %v2377_v6 }
 0x25f   : > { %1201 = vmatpush.bf16.msrb.mxu0 %v2376_v8 }
 0x263   : > { %1202 = vmatpush.bf16.msrb.mxu0 %v2375_v10 }
 0x267   : > { %1203 = vmatpush.bf16.msrb.mxu0 %v2374_v12 }
 0x26b   : > { %1204 = vmatpush.bf16.msrb.mxu0 %v2373_v14 }
 0x2cb   : > { %v863_v51 = vpop.f32.mrf.mxu0 }
 0x2cc   : > { %v867_v52 = vadd.f32 %v863_v51, %v788_v50 }
 0x2ce   : > { %v868_v53 = vadd.f32 %v2985_v3, %v867_v52 }
 0x2d0   : > { %2555 = vtanh.f32 %v868_v53 }
 0x2d3   : > { %v865_v54 = vpop.f32.mrf.mxu0 }
 0x2d6   : > { %v2556_v56 = vpop.eup %2555 }
 0x2d7   : > { %870 = vst [vmem:[#allocation12] sm:$0xff] %v2556_v56  ;;  %v2435_v57 = vpack.c.bf16 %v874_v55, %v2556_v56 }
 0x2d9   : > { %v911_v58 = vunpack.c.l.b16 %v2435_v57  ;;  %v912_v59 = vunpack.c.h.b16 %v2435_v57 }
 0x2db   : > { %v913_v60 = vpack.c.b16 %v911_v58, %v911_v58  ;;  %v914_v61 = vpack.c.b16 %v912_v59, %v912_v59 }
 0x2dd   : > { %1021 = vmatmul.bf16.vlgmr.msra.gmra.mxu1 %v913_v60  ;;  %1034 = vmatmul.bf16.vlgmr.msra.gmra.mxu2 %v914_v61 }
 0x35a   : > { %v1022_v15 = vpop.f32.mrf.mxu1 }
 0x35b   : > { %v1023_v16 = vadd.f32 %v2990_v4, %v1022_v15 }
 0x360   : > { %v1035_v17 = vpop.f32.mrf.mxu2 }
 0x361   : > { %v1036_v18 = vadd.f32 %v1035_v17, %v1023_v16 }
 0x362   : > { %v1024_v19 = vpop.f32.mrf.mxu1 }
 0x363   : > { %2557 = vtanh.f32 %v1036_v18 }
 0x368   : > { %v1037_v21 = vpop.f32.mrf.mxu2 }
 0x369   : > { %v2558_v22 = vpop.eup %2557 }
 0x36a   : > { %1040 = vst [vmem:[#allocation12 + $0x8] sm:$0xff] %v2558_v22  ;;  %v2440_v23 = vpack.c.bf16 %v1044_v20, %v2558_v22 }
 0x36c   : > { %v1082_v24 = vunpack.c.l.b16 %v2440_v23  ;;  %v1083_v25 = vunpack.c.h.b16 %v2440_v23 }
 0x36e   : > { %v1084_v26 = vpack.c.b16 %v1082_v24, %v1082_v24  ;;  %v1085_v27 = vpack.c.b16 %v1083_v25, %v1083_v25 }
 0x370   : > { %1192 = vmatmul.bf16.vlgmr.msra.gmra.mxu3 %v1084_v26  ;;  %1205 = vmatmul.bf16.vlgmr.msrb.gmra.mxu0 %v1085_v27 }
 0x3ed   : > { %v1206_v28 = vpop.f32.mrf.mxu0 }
 0x3f3   : > { %v1193_v29 = vpop.f32.mrf.mxu3 }
 0x3f4   : > { %v1194_v30 = vadd.f32 %v2995_v5, %v1193_v29 }
 0x3f5   : > { %v1208_v31 = vpop.f32.mrf.mxu0 }
 0x3f6   : > { %v1207_v32 = vadd.f32 %v1206_v28, %v1194_v30 }
 0x3f8   : > { %2559 = vtanh.f32 %v1207_v32 }
 0x3fb   : > { %v1195_v33 = vpop.f32.mrf.mxu3 }
 0x3fe   : > { %v2560_v34 = vpop.eup %2559 }
 0x3ff   : > { %1211 = vst [vmem:[#allocation12 + $0x10] sm:$0xff] %v2560_v34  ;;  %v1212_v35 = vpack.c.bf16 %v2560_v34, %v2560_v34 }
 0x401   : > { %2131 = vst [vmem:[%s2978_s8 + $0x4] sm:$0xf] %v1212_v35 }
 0x402 PF: > { %s1215_s18 = sadd.s32 2, %s2998_s13 }
 0x403   : > { %p2132_p8 = scmp.ge.s32.totalorder %s1215_s18, 8 }
 0x405   : > { %1219 = sbr.rel (%p2132_p8) target bundleno = 1502 (0x5de), region = 72 }
 0x40a   : > { %v2388_v36 = vld [vmem:[#allocation8 + $0x38] sm:$0xff]  ;;  %v2387_v37 = vld [vmem:[#allocation8 + $0x30] sm:$0xff]  ;;  %v2386_v42 = vld [vmem:[#allocation8 + $0x28] sm:$0xff] }
 0x40b   : > { %1289 = vmatpush.bf16.msra.mxu0 %v2388_v36  ;;  %v2396_v38 = vld [vmem:[#allocation9 + $0x38] sm:$0xff]  ;;  %v2395_v40 = vld [vmem:[#allocation9 + $0x30] sm:$0xff]  ;;  %v2385_v43 = vld [vmem:[#allocation8 + $0x20] sm:$0xff] }
 0x40c   : > { %v2404_v39 = vld [vmem:[#allocation9 + $0x78] sm:$0xff]  ;;  %1448 = vmatpush.bf16.msra.mxu1 %v2396_v38  ;;  %v2403_v41 = vld [vmem:[#allocation9 + $0x70] sm:$0xff]  ;;  %v2382_v46 = vld [vmem:[#allocation8 + $0x8] sm:$0xff] }
 0x40d   : > { %1461 = vmatpush.bf16.msra.mxu2 %v2404_v39  ;;  %v2384_v44 = vld [vmem:[#allocation8 + $0x18] sm:$0xff]  ;;  %v2383_v45 = vld [vmem:[#allocation8 + $0x10] sm:$0xff]  ;;  %v2381_v47 = vld [vmem:[#allocation8] sm:$0xff] }
 0x40e   : > { %v1220_v48 = vld [vmem:[#allocation12] sm:$0xff]  ;;  %v2394_v50 = vld [vmem:[#allocation9 + $0x28] sm:$0xff]  ;;  %v2393_v52 = vld [vmem:[#allocation9 + $0x20] sm:$0xff] }
 0x40f   : > { %1290 = vmatpush.bf16.msra.mxu0 %v2387_v37  ;;  %v1224_v49 = vpack.c.bf16 %v1220_v48, %v1220_v48  ;;  %v2402_v51 = vld [vmem:[#allocation9 + $0x68] sm:$0xff]  ;;  %v2401_v53 = vld [vmem:[#allocation9 + $0x60] sm:$0xff]  ;;  %v2392_v54 = vld [vmem:[#allocation9 + $0x18] sm:$0xff] }
 0x410   : > { %1449 = vmatpush.bf16.msra.mxu1 %v2395_v40  ;;  %v2400_v55 = vld [vmem:[#allocation9 + $0x58] sm:$0xff]  ;;  %v2391_v56 = vld [vmem:[#allocation9 + $0x10] sm:$0xff]  ;;  %v2390_v58 = vld [vmem:[#allocation9 + $0x8] sm:$0xff] }
 0x411   : > { %1462 = vmatpush.bf16.msra.mxu2 %v2403_v41  ;;  %v2399_v57 = vld [vmem:[#allocation9 + $0x50] sm:$0xff]  ;;  %v2398_v59 = vld [vmem:[#allocation9 + $0x48] sm:$0xff]  ;;  %v2389_v60 = vld [vmem:[#allocation9] sm:$0xff] }
 0x412   : > { %v2397_v61 = vld [vmem:[#allocation9 + $0x40] sm:$0xff]  ;;  %v2412_v62 = vld [vmem:[#allocation9 + $0xb8] sm:$0xff]  ;;  %v2411_v16 = vld [vmem:[#allocation9 + $0xb0] sm:$0xff] }
 0x413   : > { %1291 = vmatpush.bf16.msra.mxu0 %v2386_v42  ;;  %v2420_v63 = vld [vmem:[#allocation9 + $0xf8] sm:$0xff]  ;;  %1619 = vmatpush.bf16.msra.mxu3 %v2412_v62  ;;  %v1309_v9 = vld [vmem:[#allocation12 + $0x8] sm:$0xff]  ;;  %v2419_v17 = vld [vmem:[#allocation9 + $0xf0] sm:$0xff] }
 0x414   : > { %1450 = vmatpush.bf16.msra.mxu1 %v2394_v50  ;;  %v2133_v0 = vld [vmem:[%s2964_s19 + $0x8] sm:$0xf]  ;;  %v2410_v18 = vld [vmem:[#allocation9 + $0xa8] sm:$0xff]  ;;  %v2407_v23 = vld [vmem:[#allocation9 + $0x90] sm:$0xff] }
 0x415   : > { %1463 = vmatpush.bf16.msra.mxu2 %v2402_v51  ;;  %v1223_v1 = vunpack.c.l.bf16 %v2133_v0  ;;  %v2418_v19 = vld [vmem:[#allocation9 + $0xe8] sm:$0xff]  ;;  %v2417_v20 = vld [vmem:[#allocation9 + $0xe0] sm:$0xff]  ;;  %v2408_v21 = vld [vmem:[#allocation9 + $0x98] sm:$0xff] }
 0x416   : > { %v2416_v22 = vld [vmem:[#allocation9 + $0xd8] sm:$0xff]  ;;  %v2415_v24 = vld [vmem:[#allocation9 + $0xd0] sm:$0xff]  ;;  %v2406_v25 = vld [vmem:[#allocation9 + $0x88] sm:$0xff] }
 0x417   : > { %1292 = vmatpush.bf16.msra.mxu0 %v2385_v43  ;;  %1620 = vmatpush.bf16.msra.mxu3 %v2411_v16  ;;  %v2414_v26 = vld [vmem:[#allocation9 + $0xc8] sm:$0xff]  ;;  %v2405_v27 = vld [vmem:[#allocation9 + $0x80] sm:$0xff] }
 0x418   : > { %1451 = vmatpush.bf16.msra.mxu1 %v2393_v52  ;;  %v2413_v28 = vld [vmem:[#allocation9 + $0xc0] sm:$0xff]  ;;  %v1479_v34 = vld [vmem:[#allocation12 + $0x10] sm:$0xff] }
 0x419   : > { %1464 = vmatpush.bf16.msra.mxu2 %v2401_v53 }
 0x41b   : > { %1293 = vmatpush.bf16.msra.mxu0 %v2384_v44  ;;  %1621 = vmatpush.bf16.msra.mxu3 %v2410_v18 }
 0x41c   : > { %1452 = vmatpush.bf16.msra.mxu1 %v2392_v54 }
 0x41d   : > { %1465 = vmatpush.bf16.msra.mxu2 %v2400_v55 }
 0x41f   : > { %1294 = vmatpush.bf16.msra.mxu0 %v2383_v45 }
 0x420   : > { %1453 = vmatpush.bf16.msra.mxu1 %v2391_v56 }
 0x421   : > { %1466 = vmatpush.bf16.msra.mxu2 %v2399_v57 }
 0x423   : > { %1295 = vmatpush.bf16.msra.mxu0 %v2382_v46 }
 0x424   : > { %1454 = vmatpush.bf16.msra.mxu1 %v2390_v58 }
 0x425   : > { %1467 = vmatpush.bf16.msra.mxu2 %v2398_v59 }
 0x427   : > { %1296 = vmatpush.bf16.msra.mxu0 %v2381_v47 }
 0x428   : > { %1455 = vmatpush.bf16.msra.mxu1 %v2389_v60 }
 0x429   : > { %1468 = vmatpush.bf16.msra.mxu2 %v2397_v61 }
 0x42a   : > { %1297 = vmatmul.bf16.vlgmr.msra.gmra.mxu0 %v1224_v49 }
 0x42b   : > { %1632 = vmatpush.bf16.msrb.mxu0 %v2420_v63 }
 0x42f   : > { %1633 = vmatpush.bf16.msrb.mxu0 %v2419_v17 }
 0x433   : > { %1634 = vmatpush.bf16.msrb.mxu0 %v2418_v19 }
 0x437   : > { %1635 = vmatpush.bf16.msrb.mxu0 %v2417_v20 }
 0x43b   : > { %1636 = vmatpush.bf16.msrb.mxu0 %v2416_v22 }
 0x43f   : > { %1637 = vmatpush.bf16.msrb.mxu0 %v2415_v24 }
 0x443   : > { %1638 = vmatpush.bf16.msrb.mxu0 %v2414_v26 }
 0x447   : > { %1639 = vmatpush.bf16.msrb.mxu0 %v2413_v28 }
 0x4a7   : > { %v1298_v2 = vpop.f32.mrf.mxu0 }
 0x4a8   : > { %v1302_v6 = vadd.f32 %v1298_v2, %v1223_v1 }
 0x4aa   : > { %v1303_v7 = vadd.f32 %v2985_v3, %v1302_v6  ;;  %v2409_v3 = vld [vmem:[#allocation9 + $0xa0] sm:$0xff] }
 0x4ab   : > { %1622 = vmatpush.bf16.msra.mxu3 %v2409_v3 }
 0x4ac   : > { %2561 = vtanh.f32 %v1303_v7 }
 0x4af   : > { %v1300_v8 = vpop.f32.mrf.mxu0  ;;  %1623 = vmatpush.bf16.msra.mxu3 %v2408_v21 }
 0x4b2   : > { %v2562_v10 = vpop.eup %2561 }
 0x4b3   : > { %1305 = vst [vmem:[#allocation12] sm:$0xff] %v2562_v10  ;;  %v2445_v11 = vpack.c.bf16 %v1309_v9, %v2562_v10  ;;  %1624 = vmatpush.bf16.msra.mxu3 %v2407_v23 }
 0x4b5   : > { %v1346_v12 = vunpack.c.l.b16 %v2445_v11  ;;  %v1347_v13 = vunpack.c.h.b16 %v2445_v11 }
 0x4b7   : > { %v1348_v14 = vpack.c.b16 %v1346_v12, %v1346_v12  ;;  %v1349_v15 = vpack.c.b16 %v1347_v13, %v1347_v13  ;;  %1625 = vmatpush.bf16.msra.mxu3 %v2406_v25 }
 0x4b9   : > { %1456 = vmatmul.bf16.vlgmr.msra.gmra.mxu1 %v1348_v14  ;;  %1469 = vmatmul.bf16.vlgmr.msra.gmra.mxu2 %v1349_v15 }
 0x4bb   : > { %1626 = vmatpush.bf16.msra.mxu3 %v2405_v27 }
 0x536   : > { %v1457_v29 = vpop.f32.mrf.mxu1 }
 0x537   : > { %v1458_v30 = vadd.f32 %v2990_v4, %v1457_v29 }
 0x53c   : > { %v1470_v31 = vpop.f32.mrf.mxu2 }
 0x53d   : > { %v1471_v32 = vadd.f32 %v1470_v31, %v1458_v30 }
 0x53e   : > { %v1459_v33 = vpop.f32.mrf.mxu1 }
 0x53f   : > { %2563 = vtanh.f32 %v1471_v32 }
 0x544   : > { %v1472_v35 = vpop.f32.mrf.mxu2 }
 0x545   : > { %v2564_v36 = vpop.eup %2563 }
 0x546   : > { %1475 = vst [vmem:[#allocation12 + $0x8] sm:$0xff] %v2564_v36  ;;  %v2450_v37 = vpack.c.bf16 %v1479_v34, %v2564_v36 }
 0x548   : > { %v1517_v38 = vunpack.c.l.b16 %v2450_v37  ;;  %v1518_v39 = vunpack.c.h.b16 %v2450_v37 }
 0x54a   : > { %v1519_v40 = vpack.c.b16 %v1517_v38, %v1517_v38  ;;  %v1520_v41 = vpack.c.b16 %v1518_v39, %v1518_v39 }
 0x54c   : > { %1627 = vmatmul.bf16.vlgmr.msra.gmra.mxu3 %v1519_v40  ;;  %1640 = vmatmul.bf16.vlgmr.msrb.gmra.mxu0 %v1520_v41 }
 0x5c9   : > { %v1641_v42 = vpop.f32.mrf.mxu0 }
 0x5cf   : > { %v1628_v43 = vpop.f32.mrf.mxu3 }
 0x5d0   : > { %v1629_v4 = vadd.f32 %v2995_v5, %v1628_v43 }
 0x5d1   : > { %v1643_v44 = vpop.f32.mrf.mxu0 }
 0x5d2   : > { %v1642_v45 = vadd.f32 %v1641_v42, %v1629_v4 }
 0x5d4   : > { %2565 = vtanh.f32 %v1642_v45 }
 0x5d7   : > { %v1630_v46 = vpop.f32.mrf.mxu3 }
 0x5da   : > { %v2566_v47 = vpop.eup %2565 }
 0x5db   : > { %1646 = vst [vmem:[#allocation12 + $0x10] sm:$0xff] %v2566_v47  ;;  %v1647_v48 = vpack.c.bf16 %v2566_v47, %v2566_v47 }
 0x5dd   : > { %2294 = vst [vmem:[%s2978_s8 + $0x8] sm:$0xf] %v1647_v48 }
 0x5de PF: > { %s2421_s26 = smul.u32 12, %s2863_s25  ;;  %s1663_s11 = sshll.u32 %s2978_s8, 4  ;;  %s1664_s11 = int_to_ptr.vmem [resolvable:$true] %s1663_s11 }
 0x5df   : > { %s1651_s27 = scalar_lea.sflag [#allocation5], %s2960_s29  ;;  %s2707_s12 = scalar_lea.hbm %s3065_s5, 36 }
 0x5e0   : > { %s1662_s2 = scalar_lea.hbm %s3065_s5, %s2421_s26 }
 0x5e1   : > { %s1665_s19 = sshll.u32 %s1662_s2, 4  ;;  %s1666_s19 = int_to_ptr.hbm [resolvable:$true] %s1665_s19 }
 0x5e2   : > { %s2701_s20 = sshra.s32 %s1666_s19, 4  ;;  %s2702_s20 = int_to_ptr.hbm [resolvable:$true] %s2701_s20 }
 0x5e3   : > { %s2703_s30 = scalar_lea.hbm %s2702_s20, 12  ;;  %p2708_p12 = scmp.lt.s32.totalorder %s2702_s20, %s3065_s5 }
 0x5e4   : > { %p2704_p9 = scmp.ne.s32.totalorder %s2702_s20, %s2703_s30  ;;  %p2709_p13 = scmp.lt.s32.totalorder %s2707_s12, %s2703_s30 }
 0x5e6   : > { %p2705_p10 = pnand %p2704_p9, %p2931_p7  ;;  %p2710_p0 = por %p2709_p13, %p2708_p12 }
 0x5e8   : > { %p2706_p11 = pneg %p2705_p10 }
 0x5ea   : > { %p2711_p3 = pnand %p2710_p0, %p2706_p11 }
 0x5ec   : > { %2714 = shalt.err (!%p2711_p3)
}
 0x5ed   : > { %s2802_s29 = smov 64   ;;  %s2803_s16 = smov 4  }
 0x5ee   : > { %2468 = dma.vmem_to_hbm [thread:$0]  (%p2931_p7), %s1664_s11, 192, %s1666_s19, %s1651_s27, %s2802_s29, %s2802_s29, %s2803_s16  }
 0x5ef   : > { %s1679_s17 = sshll.u32 %s3066_s6, 4  ;;  %s2804_s1 = smov [#allocation12]   ;;  %s1680_s17 = int_to_ptr.hbm [resolvable:$true] %s1679_s17 }
 0x5f0   : > { %s1677_s2 = sshll.u32 %s2804_s1, 4  ;;  %s2805_s20 = smov 128   ;;  %s1678_s2 = int_to_ptr.vmem [resolvable:$true] %s1677_s2 }
 0x5f1   : > { %s2806_s30 = smov 8   ;;  %p3083_p5 = scmp.eq.s32.totalorder %s2863_s25, 2 }
 0x5f3   : > { %2470 = dma.vmem_to_hbm [thread:$0]  (%p3083_p5), %s1678_s2, 384, %s1680_s17, [#allocation13], %s2805_s20, %s2805_s20, %s2806_s30  }
 0x5f4   : > { %p3084_p2 = pmov %p3083_p5 }
 0x5f6   : > { %2772 = dma.done.wait (%p3084_p2), [#allocation13], 384   ;;  %p3085_p1 = pmov %p3084_p2 }
 0x5f8   : > { %2774 = vsyncadd (%p3085_p1), [#allocation13], 4294966912 }
 0x5f9 PF: > { %p2501_p7 = scmp.ge.s32.totalorder %s2793_s24, 2  ;;  %s1699_s15 = sand.u32 1, %s2781_s21  }
 0x5fa   : > { %s1700_s11 = scalar_lea.sflag [#allocation5], %s1699_s15 }
 0x5fb   : > { %p2489_p4 = pnand %p2501_p7, %p2877_p6 }
 0x5fd   : > { %p2490_p8 = pneg %p2489_p4 }
 0x5ff   : > { %2776 = dma.done.wait (%p2490_p8), %s1700_s11, 192  }
 0x600   : > { %2778 = vsyncadd (%p2490_p8), %s1700_s11, 4294967104  ;;  %p23_p9 = scmp.ge.s32.totalorder %s2917_s10, 5   ;;  %s3086_s21 = smov %s2785_s22 }
 0x601   : > { %s3087_s22 = smov %s2789_s23  ;;  %s3088_s23 = smov %s2927_s14 }
 0x602   : > { %s3089_s24 = smov %s2917_s10  ;;  %25 = sbr.rel (!%p23_p9) target bundleno = 11 (0xb), region = 136 }
 0x607   :  { %1706 = vsyncpa [#allocation4], 1 }
 0x608   :  { %1708 = vsyncpa [#allocation4 + $0x1], 1 }
 0x609   :  { %1709 = vsyncpa [#allocation7], 1 }
 0x60a   :  { %1710 = vsyncpa [#allocation10], 1 }
 0x60b   :  { %1711 = vsyncpa [#allocation5], 1 }
 0x60c   :  { %1713 = vsyncpa [#allocation5 + $0x1], 1 }
 0x60d   :  { %1714 = vsyncpa [#allocation13], 1 }

</bundles_post_ra>
